<compile_context>
chip_gen: v7x
topology: tpu7x:2x2x1
jax: 0.10.0
libtpu: 0.0.40
codegen_flags: <defaults>
</compile_context>

<pallas_src>
import functools
import math

import jax
import jax.numpy as jnp
from jax.experimental import pallas as pl
from jax.experimental.pallas import tpu as pltpu


# conv kernel sizes / paddings of AE_CSNMF2 (conv_encoder1, conv_encoder2,
# conv_encoder7, decoder)
K1, K2, KD = 15, 3, 41
PAD1, PAD2, PADD = 7, 1, 20


# ----------------------------------------------------------------------------
# Fused forward kernel (one batch element per grid step)
# ----------------------------------------------------------------------------
def _fused_forward_kernel(
    x_ref, w1_ref, b1_ref, w2_ref, b2_ref, w7_ref, b7_ref, wd_ref,   # inputs
    xhat_ref, lat_ref, ec_ref, et_ref,                               # outputs
    xpad, col1, h1pad, col2, h2pad, col7, hdpad, cold,               # scratch
    *, P, G, T,
):
    f32 = jnp.float32
    mm_dtype = w1_ref.dtype  # bf16 by default (f32 accumulation below)

    def conv1d(pad_scr, col_scr, src, w_ref, b_ref, pad, K, Cin, relu):
        """'same' Conv1d on a (Cin, T) value -> (Cout, T) via one MXU matmul."""
        # zero-pad along time into VMEM scratch (Cin, T + K - 1)
        pad_scr[...] = jnp.zeros(pad_scr.shape, f32)
        pad_scr[:, pl.ds(pad, T)] = src
        # im2col slab (K*Cin, T): K shifted copies (copies only — no per-tap
        # matmuls; the tap loop is folded into the contraction)
        for k in range(K):
            col_scr[pl.ds(k * Cin, Cin), :] = pad_scr[:, pl.ds(k, T)]
        acc = jnp.dot(
            w_ref[...],                       # (Cout, K*Cin)  bf16
            col_scr[...].astype(mm_dtype),    # (K*Cin, T)     bf16
            preferred_element_type=f32,
        )
        if b_ref is not None:
            acc = acc + b_ref[...]            # (Cout, 1) broadcast over lanes
        if relu:
            acc = jnp.maximum(acc, 0.0)
        return acc                            # (Cout, T) f32

    # ---------------- encoder ----------------
    x = x_ref[0].astype(f32)                                            # (P, T)
    h1 = conv1d(xpad, col1, x, w1_ref, b1_ref, PAD1, K1, P, True)       # (P, T)
    h2 = conv1d(h1pad, col2, h1, w2_ref, b2_ref, PAD2, K2, P, True)     # (P, T)
    h = conv1d(h2pad, col7, h2, w7_ref, b7_ref, PAD2, K2, P, True)      # (G, T)

    lat_ref[0] = h.astype(lat_ref.dtype)

    # ---------------- sparsity / entropy ----------------
    # TODO(synk): get_sparsity() is not defined in the provided source;
    # implemented as normalized-entropy sparsity over gestures (c) and time (t).
    eps = 1e-7
    inv_c = pl.reciprocal(jnp.sum(h, axis=0, keepdims=True) + eps, approx=True)
    p_c = h * inv_c                                                     # (G, T)
    ent_c = -jnp.sum(p_c * jnp.log(p_c + eps), axis=0, keepdims=True)   # (1, T)
    inv_t = pl.reciprocal(jnp.sum(h, axis=1, keepdims=True) + eps, approx=True)
    p_t = h * inv_t                                                     # (G, T)
    ent_t = -jnp.sum(p_t * jnp.log(p_t + eps), axis=1, keepdims=True)   # (G, 1)
    ec_ref[0] = ent_c
    et_ref[0] = ent_t

    # ---------------- decoder ----------------
    # F.conv1d(H, gesture_weight.flip(2), padding=20); flip folded into wd_ref.
    xhat = conv1d(hdpad, cold, h, wd_ref, None, PADD, KD, G, False)     # (P, T)
    xhat_ref[0] = xhat.astype(xhat_ref.dtype)


# ----------------------------------------------------------------------------
# Parameters
# ----------------------------------------------------------------------------
def init_params(key, num_pellets, num_gestures, win_size=41):
    """Raw parameters in the PyTorch layout (Cout, Cin, K)."""
    ks = jax.random.split(key, 8)

    def conv_w(k, cout, cin, ksize):
        fan_in = cin * ksize
        return ((2.0 / fan_in) ** 0.5) * jax.random.normal(
            k, (cout, cin, ksize), jnp.float32
        )

    # NOTE: conv_encoder3..6 exist in __init__ but are unused in forward().
    # TODO(synk): decoder weight is the kmeans-centers file in the original
    # module; replaced with a deterministic random tensor of the same shape.
    return {
        "w1": conv_w(ks[0], num_pellets, num_pellets, K1),
        "b1": 0.02 * jax.random.normal(ks[1], (num_pellets,), jnp.float32),
        "w2": conv_w(ks[2], num_pellets, num_pellets, K2),
        "b2": 0.02 * jax.random.normal(ks[3], (num_pellets,), jnp.float32),
        "w7": conv_w(ks[4], num_gestures, num_pellets, K2),
        "b7": 0.02 * jax.random.normal(ks[5], (num_gestures,), jnp.float32),
        "dec": jax.random.normal(
            ks[6], (num_pellets, num_gestures, win_size), jnp.float32
        ),  # conv_decoder_weight / gesture_weight
    }


def prepare_params(params, matmul_dtype=jnp.bfloat16):
    """One-time weight preprocessing, hoisted out of the forward path.

    Folds (Cout, Cin, K) -> (Cout, K*Cin) with row order (k, ci) so each conv
    becomes a single matmul against the im2col slab; the decoder flip is also
    applied here once. Weights are stored in `matmul_dtype` (bf16 default);
    biases stay f32.
    """

    def fold(w):
        cout, cin, k = w.shape
        return (
            jnp.transpose(w, (0, 2, 1)).reshape(cout, k * cin).astype(matmul_dtype)
        )

    def colb(b):
        return b.reshape(-1, 1).astype(jnp.float32)

    return {
        "w1": fold(params["w1"]), "b1": colb(params["b1"]),
        "w2": fold(params["w2"]), "b2": colb(params["b2"]),
        "w7": fold(params["w7"]), "b7": colb(params["b7"]),
        "wd": fold(jnp.flip(params["dec"], axis=2)),
    }


# ----------------------------------------------------------------------------
# Forward
# ----------------------------------------------------------------------------
def ae_csnmf2_forward(prep, x_nct, ema_inp_lens=None):
    """x_nct: (B, num_pellets, T) — native PyTorch NCT layout. pr_joint=False."""
    # TODO(synk): PR_Model (3-layer bidirectional packed LSTM + softmax) is only
    # executed when pr_joint=True; no clean Pallas equivalent, skipped.
    del ema_inp_lens

    B, P, T = x_nct.shape
    G = prep["w7"].shape[0]
    assert prep["wd"].shape == (P, KD * G)

    kernel = functools.partial(_fused_forward_kernel, P=P, G=G, T=T)

    def w_spec(shape):
        return pl.BlockSpec(shape, lambda b: (0, 0))

    inp_hat, latent_h, ec, et = pl.pallas_call(
        kernel,
        out_shape=(
            jax.ShapeDtypeStruct((B, P, T), jnp.float32),   # inp_hat
            jax.ShapeDtypeStruct((B, G, T), jnp.float32),   # latent_H
            jax.ShapeDtypeStruct((B, 1, T), jnp.float32),   # entropy_c per (b,t)
            jax.ShapeDtypeStruct((B, G, 1), jnp.float32),   # entropy_t per (b,g)
        ),
        grid_spec=pltpu.PrefetchScalarGridSpec(
            num_scalar_prefetch=0,
            grid=(B,),
            in_specs=[
                pl.BlockSpec((1, P, T), lambda b: (b, 0, 0)),
                w_spec(prep["w1"].shape), w_spec(prep["b1"].shape),
                w_spec(prep["w2"].shape), w_spec(prep["b2"].shape),
                w_spec(prep["w7"].shape), w_spec(prep["b7"].shape),
                w_spec(prep["wd"].shape),
            ],
            out_specs=(
                pl.BlockSpec((1, P, T), lambda b: (b, 0, 0)),
                pl.BlockSpec((1, G, T), lambda b: (b, 0, 0)),
                pl.BlockSpec((1, 1, T), lambda b: (b, 0, 0)),
                pl.BlockSpec((1, G, 1), lambda b: (b, 0, 0)),
            ),
            scratch_shapes=[
                pltpu.VMEM((P, T + K1 - 1), jnp.float32),   # xpad
                pltpu.VMEM((K1 * P, T), jnp.float32),       # col1
                pltpu.VMEM((P, T + K2 - 1), jnp.float32),   # h1pad
                pltpu.VMEM((K2 * P, T), jnp.float32),       # col2
                pltpu.VMEM((P, T + K2 - 1), jnp.float32),   # h2pad
                pltpu.VMEM((K2 * P, T), jnp.float32),       # col7
                pltpu.VMEM((G, T + KD - 1), jnp.float32),   # hdpad
                pltpu.VMEM((KD * G, T), jnp.float32),       # cold
            ],
        ),
        compiler_params=pltpu.CompilerParams(
            dimension_semantics=("parallel",),  # batch axis -> both TCs on v7x
        ),
    )(
        x_nct,
        prep["w1"], prep["b1"], prep["w2"], prep["b2"],
        prep["w7"], prep["b7"], prep["wd"],
    )

    entropy_c = ec[:, 0, :]   # (B, T)
    entropy_t = et[:, :, 0]   # (B, G)

    # sparsity = 1 - entropy / log(n); mean of an affine map == affine of mean.
    log_g = math.log(G) if G > 1 else 1.0
    log_t = math.log(T) if T > 1 else 1.0
    sparsity_c = 1.0 - jnp.mean(entropy_c) / log_g
    sparsity_t = 1.0 - jnp.mean(entropy_t) / log_t

    return (x_nct, inp_hat, latent_h, sparsity_c, sparsity_t, entropy_t, entropy_c)


if __name__ == "__main__":
    B, num_pellets, num_gestures, segment_len, win_size = 2, 12, 20, 32, 41

    key = jax.random.PRNGKey(0)
    k_params, k_x = jax.random.split(key)
    raw_params = init_params(k_params, num_pellets, num_gestures, win_size)
    prep = prepare_params(raw_params)          # one-time weight folding
    x = jax.random.normal(k_x, (B, num_pellets, segment_len), jnp.float32)
    ema_inp_lens = jnp.full((B,), segment_len, jnp.int32)

    outs = jax.jit(ae_csnmf2_forward)(prep, x, ema_inp_lens)
    jax.block_until_ready(outs)

    x_out, inp_hat, latent_h, sp_c, sp_t, ent_t, ent_c = outs
    assert x_out.shape == (B, num_pellets, segment_len)
    assert inp_hat.shape == (B, num_pellets, segment_len)
    assert latent_h.shape == (B, num_gestures, segment_len)
    assert sp_c.shape == () and sp_t.shape == ()
    assert ent_t.shape == (B, num_gestures) and ent_c.shape == (B, segment_len)
    print("KERNEL_OK")
</pallas_src>

<mosaic_0001>
module attributes {stable_mosaic.version = 11 : i64} {
  func.func @_fused_forward_kernel(%arg0: i32, %arg1: memref<1x12x32xf32, #tpu.memory_space<vmem>>, %arg2: memref<12x180xbf16, #tpu.memory_space<vmem>>, %arg3: memref<12x1xf32, #tpu.memory_space<vmem>>, %arg4: memref<12x36xbf16, #tpu.memory_space<vmem>>, %arg5: memref<12x1xf32, #tpu.memory_space<vmem>>, %arg6: memref<20x36xbf16, #tpu.memory_space<vmem>>, %arg7: memref<20x1xf32, #tpu.memory_space<vmem>>, %arg8: memref<12x820xbf16, #tpu.memory_space<vmem>>, %arg9: memref<1x12x32xf32, #tpu.memory_space<vmem>>, %arg10: memref<1x20x32xf32, #tpu.memory_space<vmem>>, %arg11: memref<1x1x32xf32, #tpu.memory_space<vmem>>, %arg12: memref<1x20x1xf32, #tpu.memory_space<vmem>>, %arg13: memref<12x46xf32, #tpu.memory_space<vmem>>, %arg14: memref<180x32xf32, #tpu.memory_space<vmem>>, %arg15: memref<12x34xf32, #tpu.memory_space<vmem>>, %arg16: memref<36x32xf32, #tpu.memory_space<vmem>>, %arg17: memref<12x34xf32, #tpu.memory_space<vmem>>, %arg18: memref<36x32xf32, #tpu.memory_space<vmem>>, %arg19: memref<20x72xf32, #tpu.memory_space<vmem>>, %arg20: memref<820x32xf32, #tpu.memory_space<vmem>>) attributes {dimension_semantics = [#tpu.dimension_semantics<parallel>], iteration_bounds = array<i64: 2>, scalar_prefetch = 0 : i64, scratch_operands = 8 : i64, tpu.core_type = #tpu.core_type<tc>, window_params = [{transform_indices = @transform_0, window_bounds = array<i64: 1, 12, 32>}, {pipeline_mode = #tpu.pipeline_mode<synchronous>, transform_indices = @transform_1, window_bounds = array<i64: 12, 180>}, {pipeline_mode = #tpu.pipeline_mode<synchronous>, transform_indices = @transform_2, window_bounds = array<i64: 12, 1>}, {pipeline_mode = #tpu.pipeline_mode<synchronous>, transform_indices = @transform_3, window_bounds = array<i64: 12, 36>}, {pipeline_mode = #tpu.pipeline_mode<synchronous>, transform_indices = @transform_4, window_bounds = array<i64: 12, 1>}, {pipeline_mode = #tpu.pipeline_mode<synchronous>, transform_indices = @transform_5, window_bounds = array<i64: 20, 36>}, {pipeline_mode = #tpu.pipeline_mode<synchronous>, transform_indices = @transform_6, window_bounds = array<i64: 20, 1>}, {pipeline_mode = #tpu.pipeline_mode<synchronous>, transform_indices = @transform_7, window_bounds = array<i64: 12, 820>}, {transform_indices = @transform_8, window_bounds = array<i64: 1, 12, 32>}, {transform_indices = @transform_9, window_bounds = array<i64: 1, 20, 32>}, {transform_indices = @transform_10, window_bounds = array<i64: 1, 1, 32>}, {transform_indices = @transform_11, window_bounds = array<i64: 1, 20, 1>}]} {
    %c0 = arith.constant 0 : index
    %c0_0 = arith.constant 0 : index
    %c0_1 = arith.constant 0 : index
    %0 = vector.load %arg1[%c0, %c0_0, %c0_1] : memref<1x12x32xf32, #tpu.memory_space<vmem>>, vector<1x12x32xf32>
    %1 = vector.shape_cast %0 : vector<1x12x32xf32> to vector<12x32xf32>
    %cst = arith.constant 0.000000e+00 : f32
    %2 = vector.broadcast %cst : f32 to vector<12x46xf32>
    %c0_2 = arith.constant 0 : index
    %c0_3 = arith.constant 0 : index
    %3 = vector.load %arg13[%c0_2, %c0_3] : memref<12x46xf32, #tpu.memory_space<vmem>>, vector<12x46xf32>
    tpu.vector_store %arg13[%c0_2, %c0_3], %2 {strides = array<i32>} : memref<12x46xf32, #tpu.memory_space<vmem>>, vector<12x46xf32>,
    %c0_4 = arith.constant 0 : index
    %c7 = arith.constant 7 : index
    %4 = vector.load %arg13[%c0_4, %c7] : memref<12x46xf32, #tpu.memory_space<vmem>>, vector<12x32xf32>
    tpu.vector_store %arg13[%c0_4, %c7], %1 {strides = array<i32>} : memref<12x46xf32, #tpu.memory_space<vmem>>, vector<12x32xf32>,
    %c0_5 = arith.constant 0 : index
    %c0_6 = arith.constant 0 : index
    %5 = vector.load %arg13[%c0_5, %c0_6] : memref<12x46xf32, #tpu.memory_space<vmem>>, vector<12x32xf32>
    %c0_7 = arith.constant 0 : index
    %c0_8 = arith.constant 0 : index
    %6 = vector.load %arg14[%c0_7, %c0_8] : memref<180x32xf32, #tpu.memory_space<vmem>>, vector<12x32xf32>
    tpu.vector_store %arg14[%c0_7, %c0_8], %5 {strides = array<i32>} : memref<180x32xf32, #tpu.memory_space<vmem>>, vector<12x32xf32>,
    %c0_9 = arith.constant 0 : index
    %c1 = arith.constant 1 : index
    %7 = vector.load %arg13[%c0_9, %c1] : memref<12x46xf32, #tpu.memory_space<vmem>>, vector<12x32xf32>
    %c12 = arith.constant 12 : index
    %c0_10 = arith.constant 0 : index
    %8 = vector.load %arg14[%c12, %c0_10] : memref<180x32xf32, #tpu.memory_space<vmem>>, vector<12x32xf32>
    tpu.vector_store %arg14[%c12, %c0_10], %7 {strides = array<i32>} : memref<180x32xf32, #tpu.memory_space<vmem>>, vector<12x32xf32>,
    %c0_11 = arith.constant 0 : index
    %c2 = arith.constant 2 : index
    %9 = vector.load %arg13[%c0_11, %c2] : memref<12x46xf32, #tpu.memory_space<vmem>>, vector<12x32xf32>
    %c24 = arith.constant 24 : index
    %c0_12 = arith.constant 0 : index
    %10 = vector.load %arg14[%c24, %c0_12] : memref<180x32xf32, #tpu.memory_space<vmem>>, vector<12x32xf32>
    tpu.vector_store %arg14[%c24, %c0_12], %9 {strides = array<i32>} : memref<180x32xf32, #tpu.memory_space<vmem>>, vector<12x32xf32>,
    %c0_13 = arith.constant 0 : index
    %c3 = arith.constant 3 : index
    %11 = vector.load %arg13[%c0_13, %c3] : memref<12x46xf32, #tpu.memory_space<vmem>>, vector<12x32xf32>
    %c36 = arith.constant 36 : index
    %c0_14 = arith.constant 0 : index
    %12 = vector.load %arg14[%c36, %c0_14] : memref<180x32xf32, #tpu.memory_space<vmem>>, vector<12x32xf32>
    tpu.vector_store %arg14[%c36, %c0_14], %11 {strides = array<i32>} : memref<180x32xf32, #tpu.memory_space<vmem>>, vector<12x32xf32>,
    %c0_15 = arith.constant 0 : index
    %c4 = arith.constant 4 : index
    %13 = vector.load %arg13[%c0_15, %c4] : memref<12x46xf32, #tpu.memory_space<vmem>>, vector<12x32xf32>
    %c48 = arith.constant 48 : index
    %c0_16 = arith.constant 0 : index
    %14 = vector.load %arg14[%c48, %c0_16] : memref<180x32xf32, #tpu.memory_space<vmem>>, vector<12x32xf32>
    tpu.vector_store %arg14[%c48, %c0_16], %13 {strides = array<i32>} : memref<180x32xf32, #tpu.memory_space<vmem>>, vector<12x32xf32>,
    %c0_17 = arith.constant 0 : index
    %c5 = arith.constant 5 : index
    %15 = vector.load %arg13[%c0_17, %c5] : memref<12x46xf32, #tpu.memory_space<vmem>>, vector<12x32xf32>
    %c60 = arith.constant 60 : index
    %c0_18 = arith.constant 0 : index
    %16 = vector.load %arg14[%c60, %c0_18] : memref<180x32xf32, #tpu.memory_space<vmem>>, vector<12x32xf32>
    tpu.vector_store %arg14[%c60, %c0_18], %15 {strides = array<i32>} : memref<180x32xf32, #tpu.memory_space<vmem>>, vector<12x32xf32>,
    %c0_19 = arith.constant 0 : index
    %c6 = arith.constant 6 : index
    %17 = vector.load %arg13[%c0_19, %c6] : memref<12x46xf32, #tpu.memory_space<vmem>>, vector<12x32xf32>
    %c72 = arith.constant 72 : index
    %c0_20 = arith.constant 0 : index
    %18 = vector.load %arg14[%c72, %c0_20] : memref<180x32xf32, #tpu.memory_space<vmem>>, vector<12x32xf32>
    tpu.vector_store %arg14[%c72, %c0_20], %17 {strides = array<i32>} : memref<180x32xf32, #tpu.memory_space<vmem>>, vector<12x32xf32>,
    %c0_21 = arith.constant 0 : index
    %c7_22 = arith.constant 7 : index
    %19 = vector.load %arg13[%c0_21, %c7_22] : memref<12x46xf32, #tpu.memory_space<vmem>>, vector<12x32xf32>
    %c84 = arith.constant 84 : index
    %c0_23 = arith.constant 0 : index
    %20 = vector.load %arg14[%c84, %c0_23] : memref<180x32xf32, #tpu.memory_space<vmem>>, vector<12x32xf32>
    tpu.vector_store %arg14[%c84, %c0_23], %19 {strides = array<i32>} : memref<180x32xf32, #tpu.memory_space<vmem>>, vector<12x32xf32>,
    %c0_24 = arith.constant 0 : index
    %c8 = arith.constant 8 : index
    %21 = vector.load %arg13[%c0_24, %c8] : memref<12x46xf32, #tpu.memory_space<vmem>>, vector<12x32xf32>
    %c96 = arith.constant 96 : index
    %c0_25 = arith.constant 0 : index
    %22 = vector.load %arg14[%c96, %c0_25] : memref<180x32xf32, #tpu.memory_space<vmem>>, vector<12x32xf32>
    tpu.vector_store %arg14[%c96, %c0_25], %21 {strides = array<i32>} : memref<180x32xf32, #tpu.memory_space<vmem>>, vector<12x32xf32>,
    %c0_26 = arith.constant 0 : index
    %c9 = arith.constant 9 : index
    %23 = vector.load %arg13[%c0_26, %c9] : memref<12x46xf32, #tpu.memory_space<vmem>>, vector<12x32xf32>
    %c108 = arith.constant 108 : index
    %c0_27 = arith.constant 0 : index
    %24 = vector.load %arg14[%c108, %c0_27] : memref<180x32xf32, #tpu.memory_space<vmem>>, vector<12x32xf32>
    tpu.vector_store %arg14[%c108, %c0_27], %23 {strides = array<i32>} : memref<180x32xf32, #tpu.memory_space<vmem>>, vector<12x32xf32>,
    %c0_28 = arith.constant 0 : index
    %c10 = arith.constant 10 : index
    %25 = vector.load %arg13[%c0_28, %c10] : memref<12x46xf32, #tpu.memory_space<vmem>>, vector<12x32xf32>
    %c120 = arith.constant 120 : index
    %c0_29 = arith.constant 0 : index
    %26 = vector.load %arg14[%c120, %c0_29] : memref<180x32xf32, #tpu.memory_space<vmem>>, vector<12x32xf32>
    tpu.vector_store %arg14[%c120, %c0_29], %25 {strides = array<i32>} : memref<180x32xf32, #tpu.memory_space<vmem>>, vector<12x32xf32>,
    %c0_30 = arith.constant 0 : index
    %c11 = arith.constant 11 : index
    %27 = vector.load %arg13[%c0_30, %c11] : memref<12x46xf32, #tpu.memory_space<vmem>>, vector<12x32xf32>
    %c132 = arith.constant 132 : index
    %c0_31 = arith.constant 0 : index
    %28 = vector.load %arg14[%c132, %c0_31] : memref<180x32xf32, #tpu.memory_space<vmem>>, vector<12x32xf32>
    tpu.vector_store %arg14[%c132, %c0_31], %27 {strides = array<i32>} : memref<180x32xf32, #tpu.memory_space<vmem>>, vector<12x32xf32>,
    %c0_32 = arith.constant 0 : index
    %c12_33 = arith.constant 12 : index
    %29 = vector.load %arg13[%c0_32, %c12_33] : memref<12x46xf32, #tpu.memory_space<vmem>>, vector<12x32xf32>
    %c144 = arith.constant 144 : index
    %c0_34 = arith.constant 0 : index
    %30 = vector.load %arg14[%c144, %c0_34] : memref<180x32xf32, #tpu.memory_space<vmem>>, vector<12x32xf32>
    tpu.vector_store %arg14[%c144, %c0_34], %29 {strides = array<i32>} : memref<180x32xf32, #tpu.memory_space<vmem>>, vector<12x32xf32>,
    %c0_35 = arith.constant 0 : index
    %c13 = arith.constant 13 : index
    %31 = vector.load %arg13[%c0_35, %c13] : memref<12x46xf32, #tpu.memory_space<vmem>>, vector<12x32xf32>
    %c156 = arith.constant 156 : index
    %c0_36 = arith.constant 0 : index
    %32 = vector.load %arg14[%c156, %c0_36] : memref<180x32xf32, #tpu.memory_space<vmem>>, vector<12x32xf32>
    tpu.vector_store %arg14[%c156, %c0_36], %31 {strides = array<i32>} : memref<180x32xf32, #tpu.memory_space<vmem>>, vector<12x32xf32>,
    %c0_37 = arith.constant 0 : index
    %c14 = arith.constant 14 : index
    %33 = vector.load %arg13[%c0_37, %c14] : memref<12x46xf32, #tpu.memory_space<vmem>>, vector<12x32xf32>
    %c168 = arith.constant 168 : index
    %c0_38 = arith.constant 0 : index
    %34 = vector.load %arg14[%c168, %c0_38] : memref<180x32xf32, #tpu.memory_space<vmem>>, vector<12x32xf32>
    tpu.vector_store %arg14[%c168, %c0_38], %33 {strides = array<i32>} : memref<180x32xf32, #tpu.memory_space<vmem>>, vector<12x32xf32>,
    %c0_39 = arith.constant 0 : index
    %c0_40 = arith.constant 0 : index
    %35 = vector.load %arg2[%c0_39, %c0_40] : memref<12x180xbf16, #tpu.memory_space<vmem>>, vector<12x180xbf16>
    %c0_41 = arith.constant 0 : index
    %c0_42 = arith.constant 0 : index
    %36 = vector.load %arg14[%c0_41, %c0_42] : memref<180x32xf32, #tpu.memory_space<vmem>>, vector<180x32xf32>
    %37 = arith.truncf %36 : vector<180x32xf32> to vector<180x32xbf16>
    %cst_43 = arith.constant dense<0.000000e+00> : vector<12x32xf32>
    %38 = tpu.matmul %35, %37, %cst_43 {dimension_numbers = #tpu.dot_dimension_numbers<[1], [0], [0], [1], [0, 0, 1, 1], [], []>} : vector<12x180xbf16>, vector<180x32xbf16>, vector<12x32xf32> -> vector<12x32xf32>
    %c0_44 = arith.constant 0 : index
    %c0_45 = arith.constant 0 : index
    %39 = vector.load %arg3[%c0_44, %c0_45] : memref<12x1xf32, #tpu.memory_space<vmem>>, vector<12x1xf32>
    %40 = vector.broadcast %39 : vector<12x1xf32> to vector<12x32xf32>
    %41 = arith.addf %38, %40 : vector<12x32xf32>
    %cst_46 = arith.constant 0.000000e+00 : f32
    %42 = vector.broadcast %cst_46 : f32 to vector<12x32xf32>
    %43 = arith.maximumf %41, %42 : vector<12x32xf32>
    %cst_47 = arith.constant 0.000000e+00 : f32
    %44 = vector.broadcast %cst_47 : f32 to vector<12x34xf32>
    %c0_48 = arith.constant 0 : index
    %c0_49 = arith.constant 0 : index
    %45 = vector.load %arg15[%c0_48, %c0_49] : memref<12x34xf32, #tpu.memory_space<vmem>>, vector<12x34xf32>
    tpu.vector_store %arg15[%c0_48, %c0_49], %44 {strides = array<i32>} : memref<12x34xf32, #tpu.memory_space<vmem>>, vector<12x34xf32>,
    %c0_50 = arith.constant 0 : index
    %c1_51 = arith.constant 1 : index
    %46 = vector.load %arg15[%c0_50, %c1_51] : memref<12x34xf32, #tpu.memory_space<vmem>>, vector<12x32xf32>
    tpu.vector_store %arg15[%c0_50, %c1_51], %43 {strides = array<i32>} : memref<12x34xf32, #tpu.memory_space<vmem>>, vector<12x32xf32>,
    %c0_52 = arith.constant 0 : index
    %c0_53 = arith.constant 0 : index
    %47 = vector.load %arg15[%c0_52, %c0_53] : memref<12x34xf32, #tpu.memory_space<vmem>>, vector<12x32xf32>
    %c0_54 = arith.constant 0 : index
    %c0_55 = arith.constant 0 : index
    %48 = vector.load %arg16[%c0_54, %c0_55] : memref<36x32xf32, #tpu.memory_space<vmem>>, vector<12x32xf32>
    tpu.vector_store %arg16[%c0_54, %c0_55], %47 {strides = array<i32>} : memref<36x32xf32, #tpu.memory_space<vmem>>, vector<12x32xf32>,
    %c0_56 = arith.constant 0 : index
    %c1_57 = arith.constant 1 : index
    %49 = vector.load %arg15[%c0_56, %c1_57] : memref<12x34xf32, #tpu.memory_space<vmem>>, vector<12x32xf32>
    %c12_58 = arith.constant 12 : index
    %c0_59 = arith.constant 0 : index
    %50 = vector.load %arg16[%c12_58, %c0_59] : memref<36x32xf32, #tpu.memory_space<vmem>>, vector<12x32xf32>
    tpu.vector_store %arg16[%c12_58, %c0_59], %49 {strides = array<i32>} : memref<36x32xf32, #tpu.memory_space<vmem>>, vector<12x32xf32>,
    %c0_60 = arith.constant 0 : index
    %c2_61 = arith.constant 2 : index
    %51 = vector.load %arg15[%c0_60, %c2_61] : memref<12x34xf32, #tpu.memory_space<vmem>>, vector<12x32xf32>
    %c24_62 = arith.constant 24 : index
    %c0_63 = arith.constant 0 : index
    %52 = vector.load %arg16[%c24_62, %c0_63] : memref<36x32xf32, #tpu.memory_space<vmem>>, vector<12x32xf32>
    tpu.vector_store %arg16[%c24_62, %c0_63], %51 {strides = array<i32>} : memref<36x32xf32, #tpu.memory_space<vmem>>, vector<12x32xf32>,
    %c0_64 = arith.constant 0 : index
    %c0_65 = arith.constant 0 : index
    %53 = vector.load %arg4[%c0_64, %c0_65] : memref<12x36xbf16, #tpu.memory_space<vmem>>, vector<12x36xbf16>
    %c0_66 = arith.constant 0 : index
    %c0_67 = arith.constant 0 : index
    %54 = vector.load %arg16[%c0_66, %c0_67] : memref<36x32xf32, #tpu.memory_space<vmem>>, vector<36x32xf32>
    %55 = arith.truncf %54 : vector<36x32xf32> to vector<36x32xbf16>
    %cst_68 = arith.constant dense<0.000000e+00> : vector<12x32xf32>
    %56 = tpu.matmul %53, %55, %cst_68 {dimension_numbers = #tpu.dot_dimension_numbers<[1], [0], [0], [1], [0, 0, 1, 1], [], []>} : vector<12x36xbf16>, vector<36x32xbf16>, vector<12x32xf32> -> vector<12x32xf32>
    %c0_69 = arith.constant 0 : index
    %c0_70 = arith.constant 0 : index
    %57 = vector.load %arg5[%c0_69, %c0_70] : memref<12x1xf32, #tpu.memory_space<vmem>>, vector<12x1xf32>
    %58 = vector.broadcast %57 : vector<12x1xf32> to vector<12x32xf32>
    %59 = arith.addf %56, %58 : vector<12x32xf32>
    %cst_71 = arith.constant 0.000000e+00 : f32
    %60 = vector.broadcast %cst_71 : f32 to vector<12x32xf32>
    %61 = arith.maximumf %59, %60 : vector<12x32xf32>
    %cst_72 = arith.constant 0.000000e+00 : f32
    %62 = vector.broadcast %cst_72 : f32 to vector<12x34xf32>
    %c0_73 = arith.constant 0 : index
    %c0_74 = arith.constant 0 : index
    %63 = vector.load %arg17[%c0_73, %c0_74] : memref<12x34xf32, #tpu.memory_space<vmem>>, vector<12x34xf32>
    tpu.vector_store %arg17[%c0_73, %c0_74], %62 {strides = array<i32>} : memref<12x34xf32, #tpu.memory_space<vmem>>, vector<12x34xf32>,
    %c0_75 = arith.constant 0 : index
    %c1_76 = arith.constant 1 : index
    %64 = vector.load %arg17[%c0_75, %c1_76] : memref<12x34xf32, #tpu.memory_space<vmem>>, vector<12x32xf32>
    tpu.vector_store %arg17[%c0_75, %c1_76], %61 {strides = array<i32>} : memref<12x34xf32, #tpu.memory_space<vmem>>, vector<12x32xf32>,
    %c0_77 = arith.constant 0 : index
    %c0_78 = arith.constant 0 : index
    %65 = vector.load %arg17[%c0_77, %c0_78] : memref<12x34xf32, #tpu.memory_space<vmem>>, vector<12x32xf32>
    %c0_79 = arith.constant 0 : index
    %c0_80 = arith.constant 0 : index
    %66 = vector.load %arg18[%c0_79, %c0_80] : memref<36x32xf32, #tpu.memory_space<vmem>>, vector<12x32xf32>
    tpu.vector_store %arg18[%c0_79, %c0_80], %65 {strides = array<i32>} : memref<36x32xf32, #tpu.memory_space<vmem>>, vector<12x32xf32>,
    %c0_81 = arith.constant 0 : index
    %c1_82 = arith.constant 1 : index
    %67 = vector.load %arg17[%c0_81, %c1_82] : memref<12x34xf32, #tpu.memory_space<vmem>>, vector<12x32xf32>
    %c12_83 = arith.constant 12 : index
    %c0_84 = arith.constant 0 : index
    %68 = vector.load %arg18[%c12_83, %c0_84] : memref<36x32xf32, #tpu.memory_space<vmem>>, vector<12x32xf32>
    tpu.vector_store %arg18[%c12_83, %c0_84], %67 {strides = array<i32>} : memref<36x32xf32, #tpu.memory_space<vmem>>, vector<12x32xf32>,
    %c0_85 = arith.constant 0 : index
    %c2_86 = arith.constant 2 : index
    %69 = vector.load %arg17[%c0_85, %c2_86] : memref<12x34xf32, #tpu.memory_space<vmem>>, vector<12x32xf32>
    %c24_87 = arith.constant 24 : index
    %c0_88 = arith.constant 0 : index
    %70 = vector.load %arg18[%c24_87, %c0_88] : memref<36x32xf32, #tpu.memory_space<vmem>>, vector<12x32xf32>
    tpu.vector_store %arg18[%c24_87, %c0_88], %69 {strides = array<i32>} : memref<36x32xf32, #tpu.memory_space<vmem>>, vector<12x32xf32>,
    %c0_89 = arith.constant 0 : index
    %c0_90 = arith.constant 0 : index
    %71 = vector.load %arg6[%c0_89, %c0_90] : memref<20x36xbf16, #tpu.memory_space<vmem>>, vector<20x36xbf16>
    %c0_91 = arith.constant 0 : index
    %c0_92 = arith.constant 0 : index
    %72 = vector.load %arg18[%c0_91, %c0_92] : memref<36x32xf32, #tpu.memory_space<vmem>>, vector<36x32xf32>
    %73 = arith.truncf %72 : vector<36x32xf32> to vector<36x32xbf16>
    %cst_93 = arith.constant dense<0.000000e+00> : vector<20x32xf32>
    %74 = tpu.matmul %71, %73, %cst_93 {dimension_numbers = #tpu.dot_dimension_numbers<[1], [0], [0], [1], [0, 0, 1, 1], [], []>} : vector<20x36xbf16>, vector<36x32xbf16>, vector<20x32xf32> -> vector<20x32xf32>
    %c0_94 = arith.constant 0 : index
    %c0_95 = arith.constant 0 : index
    %75 = vector.load %arg7[%c0_94, %c0_95] : memref<20x1xf32, #tpu.memory_space<vmem>>, vector<20x1xf32>
    %76 = vector.broadcast %75 : vector<20x1xf32> to vector<20x32xf32>
    %77 = arith.addf %74, %76 : vector<20x32xf32>
    %cst_96 = arith.constant 0.000000e+00 : f32
    %78 = vector.broadcast %cst_96 : f32 to vector<20x32xf32>
    %79 = arith.maximumf %77, %78 : vector<20x32xf32>
    %c0_97 = arith.constant 0 : index
    %c0_98 = arith.constant 0 : index
    %c0_99 = arith.constant 0 : index
    %80 = vector.load %arg10[%c0_97, %c0_98, %c0_99] : memref<1x20x32xf32, #tpu.memory_space<vmem>>, vector<1x20x32xf32>
    %81 = vector.shape_cast %80 : vector<1x20x32xf32> to vector<20x32xf32>
    %82 = vector.shape_cast %79 : vector<20x32xf32> to vector<1x20x32xf32>
    tpu.vector_store %arg10[%c0_97, %c0_98, %c0_99], %82 {strides = array<i32>} : memref<1x20x32xf32, #tpu.memory_space<vmem>>, vector<1x20x32xf32>,
    %cst_100 = arith.constant dense<0.000000e+00> : vector<32xf32>
    %83 = vector.multi_reduction <add>, %79, %cst_100 [0] : vector<20x32xf32> to vector<32xf32>
    %84 = vector.shape_cast %83 : vector<32xf32> to vector<1x32xf32>
    %cst_101 = arith.constant 1.000000e-07 : f32
    %85 = vector.broadcast %cst_101 : f32 to vector<1x32xf32>
    %86 = arith.addf %84, %85 : vector<1x32xf32>
    %87 = tpu.reciprocal %86 {approx = true} : vector<1x32xf32> -> vector<1x32xf32>
    %88 = vector.broadcast %87 : vector<1x32xf32> to vector<20x32xf32>
    %89 = arith.mulf %79, %88 : vector<20x32xf32>
    %cst_102 = arith.constant 1.000000e-07 : f32
    %90 = vector.broadcast %cst_102 : f32 to vector<20x32xf32>
    %91 = arith.addf %89, %90 : vector<20x32xf32>
    %92 = math.log %91 : vector<20x32xf32>
    %93 = arith.mulf %89, %92 : vector<20x32xf32>
    %cst_103 = arith.constant dense<0.000000e+00> : vector<32xf32>
    %94 = vector.multi_reduction <add>, %93, %cst_103 [0] : vector<20x32xf32> to vector<32xf32>
    %95 = vector.shape_cast %94 : vector<32xf32> to vector<1x32xf32>
    %cst_104 = arith.constant 0.000000e+00 : f32
    %96 = vector.broadcast %cst_104 : f32 to vector<1x32xf32>
    %97 = arith.subf %96, %95 : vector<1x32xf32>
    %cst_105 = arith.constant dense<0.000000e+00> : vector<20xf32>
    %98 = vector.multi_reduction <add>, %79, %cst_105 [1] : vector<20x32xf32> to vector<20xf32>
    %99 = vector.shape_cast %98 : vector<20xf32> to vector<20x1xf32>
    %cst_106 = arith.constant 1.000000e-07 : f32
    %100 = vector.broadcast %cst_106 : f32 to vector<20x1xf32>
    %101 = arith.addf %99, %100 : vector<20x1xf32>
    %102 = tpu.reciprocal %101 {approx = true} : vector<20x1xf32> -> vector<20x1xf32>
    %103 = vector.broadcast %102 : vector<20x1xf32> to vector<20x32xf32>
    %104 = arith.mulf %79, %103 : vector<20x32xf32>
    %cst_107 = arith.constant 1.000000e-07 : f32
    %105 = vector.broadcast %cst_107 : f32 to vector<20x32xf32>
    %106 = arith.addf %104, %105 : vector<20x32xf32>
    %107 = math.log %106 : vector<20x32xf32>
    %108 = arith.mulf %104, %107 : vector<20x32xf32>
    %cst_108 = arith.constant dense<0.000000e+00> : vector<20xf32>
    %109 = vector.multi_reduction <add>, %108, %cst_108 [1] : vector<20x32xf32> to vector<20xf32>
    %110 = vector.shape_cast %109 : vector<20xf32> to vector<20x1xf32>
    %cst_109 = arith.constant 0.000000e+00 : f32
    %111 = vector.broadcast %cst_109 : f32 to vector<20x1xf32>
    %112 = arith.subf %111, %110 : vector<20x1xf32>
    %c0_110 = arith.constant 0 : index
    %c0_111 = arith.constant 0 : index
    %c0_112 = arith.constant 0 : index
    %113 = vector.load %arg11[%c0_110, %c0_111, %c0_112] : memref<1x1x32xf32, #tpu.memory_space<vmem>>, vector<1x1x32xf32>
    %114 = vector.shape_cast %113 : vector<1x1x32xf32> to vector<1x32xf32>
    %115 = vector.shape_cast %97 : vector<1x32xf32> to vector<1x1x32xf32>
    tpu.vector_store %arg11[%c0_110, %c0_111, %c0_112], %115 {strides = array<i32>} : memref<1x1x32xf32, #tpu.memory_space<vmem>>, vector<1x1x32xf32>,
    %c0_113 = arith.constant 0 : index
    %c0_114 = arith.constant 0 : index
    %c0_115 = arith.constant 0 : index
    %116 = vector.load %arg12[%c0_113, %c0_114, %c0_115] : memref<1x20x1xf32, #tpu.memory_space<vmem>>, vector<1x20x1xf32>
    %117 = vector.shape_cast %116 : vector<1x20x1xf32> to vector<20x1xf32>
    %118 = vector.shape_cast %112 : vector<20x1xf32> to vector<1x20x1xf32>
    tpu.vector_store %arg12[%c0_113, %c0_114, %c0_115], %118 {strides = array<i32>} : memref<1x20x1xf32, #tpu.memory_space<vmem>>, vector<1x20x1xf32>,
    %cst_116 = arith.constant 0.000000e+00 : f32
    %119 = vector.broadcast %cst_116 : f32 to vector<20x72xf32>
    %c0_117 = arith.constant 0 : index
    %c0_118 = arith.constant 0 : index
    %120 = vector.load %arg19[%c0_117, %c0_118] : memref<20x72xf32, #tpu.memory_space<vmem>>, vector<20x72xf32>
    tpu.vector_store %arg19[%c0_117, %c0_118], %119 {strides = array<i32>} : memref<20x72xf32, #tpu.memory_space<vmem>>, vector<20x72xf32>,
    %c0_119 = arith.constant 0 : index
    %c20 = arith.constant 20 : index
    %121 = vector.load %arg19[%c0_119, %c20] : memref<20x72xf32, #tpu.memory_space<vmem>>, vector<20x32xf32>
    tpu.vector_store %arg19[%c0_119, %c20], %79 {strides = array<i32>} : memref<20x72xf32, #tpu.memory_space<vmem>>, vector<20x32xf32>,
    %c0_120 = arith.constant 0 : index
    %c0_121 = arith.constant 0 : index
    %122 = vector.load %arg19[%c0_120, %c0_121] : memref<20x72xf32, #tpu.memory_space<vmem>>, vector<20x32xf32>
    %c0_122 = arith.constant 0 : index
    %c0_123 = arith.constant 0 : index
    %123 = vector.load %arg20[%c0_122, %c0_123] : memref<820x32xf32, #tpu.memory_space<vmem>>, vector<20x32xf32>
    tpu.vector_store %arg20[%c0_122, %c0_123], %122 {strides = array<i32>} : memref<820x32xf32, #tpu.memory_space<vmem>>, vector<20x32xf32>,
    %c0_124 = arith.constant 0 : index
    %c1_125 = arith.constant 1 : index
    %124 = vector.load %arg19[%c0_124, %c1_125] : memref<20x72xf32, #tpu.memory_space<vmem>>, vector<20x32xf32>
    %c20_126 = arith.constant 20 : index
    %c0_127 = arith.constant 0 : index
    %125 = vector.load %arg20[%c20_126, %c0_127] : memref<820x32xf32, #tpu.memory_space<vmem>>, vector<20x32xf32>
    tpu.vector_store %arg20[%c20_126, %c0_127], %124 {strides = array<i32>} : memref<820x32xf32, #tpu.memory_space<vmem>>, vector<20x32xf32>,
    %c0_128 = arith.constant 0 : index
    %c2_129 = arith.constant 2 : index
    %126 = vector.load %arg19[%c0_128, %c2_129] : memref<20x72xf32, #tpu.memory_space<vmem>>, vector<20x32xf32>
    %c40 = arith.constant 40 : index
    %c0_130 = arith.constant 0 : index
    %127 = vector.load %arg20[%c40, %c0_130] : memref<820x32xf32, #tpu.memory_space<vmem>>, vector<20x32xf32>
    tpu.vector_store %arg20[%c40, %c0_130], %126 {strides = array<i32>} : memref<820x32xf32, #tpu.memory_space<vmem>>, vector<20x32xf32>,
    %c0_131 = arith.constant 0 : index
    %c3_132 = arith.constant 3 : index
    %128 = vector.load %arg19[%c0_131, %c3_132] : memref<20x72xf32, #tpu.memory_space<vmem>>, vector<20x32xf32>
    %c60_133 = arith.constant 60 : index
    %c0_134 = arith.constant 0 : index
    %129 = vector.load %arg20[%c60_133, %c0_134] : memref<820x32xf32, #tpu.memory_space<vmem>>, vector<20x32xf32>
    tpu.vector_store %arg20[%c60_133, %c0_134], %128 {strides = array<i32>} : memref<820x32xf32, #tpu.memory_space<vmem>>, vector<20x32xf32>,
    %c0_135 = arith.constant 0 : index
    %c4_136 = arith.constant 4 : index
    %130 = vector.load %arg19[%c0_135, %c4_136] : memref<20x72xf32, #tpu.memory_space<vmem>>, vector<20x32xf32>
    %c80 = arith.constant 80 : index
    %c0_137 = arith.constant 0 : index
    %131 = vector.load %arg20[%c80, %c0_137] : memref<820x32xf32, #tpu.memory_space<vmem>>, vector<20x32xf32>
    tpu.vector_store %arg20[%c80, %c0_137], %130 {strides = array<i32>} : memref<820x32xf32, #tpu.memory_space<vmem>>, vector<20x32xf32>,
    %c0_138 = arith.constant 0 : index
    %c5_139 = arith.constant 5 : index
    %132 = vector.load %arg19[%c0_138, %c5_139] : memref<20x72xf32, #tpu.memory_space<vmem>>, vector<20x32xf32>
    %c100 = arith.constant 100 : index
    %c0_140 = arith.constant 0 : index
    %133 = vector.load %arg20[%c100, %c0_140] : memref<820x32xf32, #tpu.memory_space<vmem>>, vector<20x32xf32>
    tpu.vector_store %arg20[%c100, %c0_140], %132 {strides = array<i32>} : memref<820x32xf32, #tpu.memory_space<vmem>>, vector<20x32xf32>,
    %c0_141 = arith.constant 0 : index
    %c6_142 = arith.constant 6 : index
    %134 = vector.load %arg19[%c0_141, %c6_142] : memref<20x72xf32, #tpu.memory_space<vmem>>, vector<20x32xf32>
    %c120_143 = arith.constant 120 : index
    %c0_144 = arith.constant 0 : index
    %135 = vector.load %arg20[%c120_143, %c0_144] : memref<820x32xf32, #tpu.memory_space<vmem>>, vector<20x32xf32>
    tpu.vector_store %arg20[%c120_143, %c0_144], %134 {strides = array<i32>} : memref<820x32xf32, #tpu.memory_space<vmem>>, vector<20x32xf32>,
    %c0_145 = arith.constant 0 : index
    %c7_146 = arith.constant 7 : index
    %136 = vector.load %arg19[%c0_145, %c7_146] : memref<20x72xf32, #tpu.memory_space<vmem>>, vector<20x32xf32>
    %c140 = arith.constant 140 : index
    %c0_147 = arith.constant 0 : index
    %137 = vector.load %arg20[%c140, %c0_147] : memref<820x32xf32, #tpu.memory_space<vmem>>, vector<20x32xf32>
    tpu.vector_store %arg20[%c140, %c0_147], %136 {strides = array<i32>} : memref<820x32xf32, #tpu.memory_space<vmem>>, vector<20x32xf32>,
    %c0_148 = arith.constant 0 : index
    %c8_149 = arith.constant 8 : index
    %138 = vector.load %arg19[%c0_148, %c8_149] : memref<20x72xf32, #tpu.memory_space<vmem>>, vector<20x32xf32>
    %c160 = arith.constant 160 : index
    %c0_150 = arith.constant 0 : index
    %139 = vector.load %arg20[%c160, %c0_150] : memref<820x32xf32, #tpu.memory_space<vmem>>, vector<20x32xf32>
    tpu.vector_store %arg20[%c160, %c0_150], %138 {strides = array<i32>} : memref<820x32xf32, #tpu.memory_space<vmem>>, vector<20x32xf32>,
    %c0_151 = arith.constant 0 : index
    %c9_152 = arith.constant 9 : index
    %140 = vector.load %arg19[%c0_151, %c9_152] : memref<20x72xf32, #tpu.memory_space<vmem>>, vector<20x32xf32>
    %c180 = arith.constant 180 : index
    %c0_153 = arith.constant 0 : index
    %141 = vector.load %arg20[%c180, %c0_153] : memref<820x32xf32, #tpu.memory_space<vmem>>, vector<20x32xf32>
    tpu.vector_store %arg20[%c180, %c0_153], %140 {strides = array<i32>} : memref<820x32xf32, #tpu.memory_space<vmem>>, vector<20x32xf32>,
    %c0_154 = arith.constant 0 : index
    %c10_155 = arith.constant 10 : index
    %142 = vector.load %arg19[%c0_154, %c10_155] : memref<20x72xf32, #tpu.memory_space<vmem>>, vector<20x32xf32>
    %c200 = arith.constant 200 : index
    %c0_156 = arith.constant 0 : index
    %143 = vector.load %arg20[%c200, %c0_156] : memref<820x32xf32, #tpu.memory_space<vmem>>, vector<20x32xf32>
    tpu.vector_store %arg20[%c200, %c0_156], %142 {strides = array<i32>} : memref<820x32xf32, #tpu.memory_space<vmem>>, vector<20x32xf32>,
    %c0_157 = arith.constant 0 : index
    %c11_158 = arith.constant 11 : index
    %144 = vector.load %arg19[%c0_157, %c11_158] : memref<20x72xf32, #tpu.memory_space<vmem>>, vector<20x32xf32>
    %c220 = arith.constant 220 : index
    %c0_159 = arith.constant 0 : index
    %145 = vector.load %arg20[%c220, %c0_159] : memref<820x32xf32, #tpu.memory_space<vmem>>, vector<20x32xf32>
    tpu.vector_store %arg20[%c220, %c0_159], %144 {strides = array<i32>} : memref<820x32xf32, #tpu.memory_space<vmem>>, vector<20x32xf32>,
    %c0_160 = arith.constant 0 : index
    %c12_161 = arith.constant 12 : index
    %146 = vector.load %arg19[%c0_160, %c12_161] : memref<20x72xf32, #tpu.memory_space<vmem>>, vector<20x32xf32>
    %c240 = arith.constant 240 : index
    %c0_162 = arith.constant 0 : index
    %147 = vector.load %arg20[%c240, %c0_162] : memref<820x32xf32, #tpu.memory_space<vmem>>, vector<20x32xf32>
    tpu.vector_store %arg20[%c240, %c0_162], %146 {strides = array<i32>} : memref<820x32xf32, #tpu.memory_space<vmem>>, vector<20x32xf32>,
    %c0_163 = arith.constant 0 : index
    %c13_164 = arith.constant 13 : index
    %148 = vector.load %arg19[%c0_163, %c13_164] : memref<20x72xf32, #tpu.memory_space<vmem>>, vector<20x32xf32>
    %c260 = arith.constant 260 : index
    %c0_165 = arith.constant 0 : index
    %149 = vector.load %arg20[%c260, %c0_165] : memref<820x32xf32, #tpu.memory_space<vmem>>, vector<20x32xf32>
    tpu.vector_store %arg20[%c260, %c0_165], %148 {strides = array<i32>} : memref<820x32xf32, #tpu.memory_space<vmem>>, vector<20x32xf32>,
    %c0_166 = arith.constant 0 : index
    %c14_167 = arith.constant 14 : index
    %150 = vector.load %arg19[%c0_166, %c14_167] : memref<20x72xf32, #tpu.memory_space<vmem>>, vector<20x32xf32>
    %c280 = arith.constant 280 : index
    %c0_168 = arith.constant 0 : index
    %151 = vector.load %arg20[%c280, %c0_168] : memref<820x32xf32, #tpu.memory_space<vmem>>, vector<20x32xf32>
    tpu.vector_store %arg20[%c280, %c0_168], %150 {strides = array<i32>} : memref<820x32xf32, #tpu.memory_space<vmem>>, vector<20x32xf32>,
    %c0_169 = arith.constant 0 : index
    %c15 = arith.constant 15 : index
    %152 = vector.load %arg19[%c0_169, %c15] : memref<20x72xf32, #tpu.memory_space<vmem>>, vector<20x32xf32>
    %c300 = arith.constant 300 : index
    %c0_170 = arith.constant 0 : index
    %153 = vector.load %arg20[%c300, %c0_170] : memref<820x32xf32, #tpu.memory_space<vmem>>, vector<20x32xf32>
    tpu.vector_store %arg20[%c300, %c0_170], %152 {strides = array<i32>} : memref<820x32xf32, #tpu.memory_space<vmem>>, vector<20x32xf32>,
    %c0_171 = arith.constant 0 : index
    %c16 = arith.constant 16 : index
    %154 = vector.load %arg19[%c0_171, %c16] : memref<20x72xf32, #tpu.memory_space<vmem>>, vector<20x32xf32>
    %c320 = arith.constant 320 : index
    %c0_172 = arith.constant 0 : index
    %155 = vector.load %arg20[%c320, %c0_172] : memref<820x32xf32, #tpu.memory_space<vmem>>, vector<20x32xf32>
    tpu.vector_store %arg20[%c320, %c0_172], %154 {strides = array<i32>} : memref<820x32xf32, #tpu.memory_space<vmem>>, vector<20x32xf32>,
    %c0_173 = arith.constant 0 : index
    %c17 = arith.constant 17 : index
    %156 = vector.load %arg19[%c0_173, %c17] : memref<20x72xf32, #tpu.memory_space<vmem>>, vector<20x32xf32>
    %c340 = arith.constant 340 : index
    %c0_174 = arith.constant 0 : index
    %157 = vector.load %arg20[%c340, %c0_174] : memref<820x32xf32, #tpu.memory_space<vmem>>, vector<20x32xf32>
    tpu.vector_store %arg20[%c340, %c0_174], %156 {strides = array<i32>} : memref<820x32xf32, #tpu.memory_space<vmem>>, vector<20x32xf32>,
    %c0_175 = arith.constant 0 : index
    %c18 = arith.constant 18 : index
    %158 = vector.load %arg19[%c0_175, %c18] : memref<20x72xf32, #tpu.memory_space<vmem>>, vector<20x32xf32>
    %c360 = arith.constant 360 : index
    %c0_176 = arith.constant 0 : index
    %159 = vector.load %arg20[%c360, %c0_176] : memref<820x32xf32, #tpu.memory_space<vmem>>, vector<20x32xf32>
    tpu.vector_store %arg20[%c360, %c0_176], %158 {strides = array<i32>} : memref<820x32xf32, #tpu.memory_space<vmem>>, vector<20x32xf32>,
    %c0_177 = arith.constant 0 : index
    %c19 = arith.constant 19 : index
    %160 = vector.load %arg19[%c0_177, %c19] : memref<20x72xf32, #tpu.memory_space<vmem>>, vector<20x32xf32>
    %c380 = arith.constant 380 : index
    %c0_178 = arith.constant 0 : index
    %161 = vector.load %arg20[%c380, %c0_178] : memref<820x32xf32, #tpu.memory_space<vmem>>, vector<20x32xf32>
    tpu.vector_store %arg20[%c380, %c0_178], %160 {strides = array<i32>} : memref<820x32xf32, #tpu.memory_space<vmem>>, vector<20x32xf32>,
    %c0_179 = arith.constant 0 : index
    %c20_180 = arith.constant 20 : index
    %162 = vector.load %arg19[%c0_179, %c20_180] : memref<20x72xf32, #tpu.memory_space<vmem>>, vector<20x32xf32>
    %c400 = arith.constant 400 : index
    %c0_181 = arith.constant 0 : index
    %163 = vector.load %arg20[%c400, %c0_181] : memref<820x32xf32, #tpu.memory_space<vmem>>, vector<20x32xf32>
    tpu.vector_store %arg20[%c400, %c0_181], %162 {strides = array<i32>} : memref<820x32xf32, #tpu.memory_space<vmem>>, vector<20x32xf32>,
    %c0_182 = arith.constant 0 : index
    %c21 = arith.constant 21 : index
    %164 = vector.load %arg19[%c0_182, %c21] : memref<20x72xf32, #tpu.memory_space<vmem>>, vector<20x32xf32>
    %c420 = arith.constant 420 : index
    %c0_183 = arith.constant 0 : index
    %165 = vector.load %arg20[%c420, %c0_183] : memref<820x32xf32, #tpu.memory_space<vmem>>, vector<20x32xf32>
    tpu.vector_store %arg20[%c420, %c0_183], %164 {strides = array<i32>} : memref<820x32xf32, #tpu.memory_space<vmem>>, vector<20x32xf32>,
    %c0_184 = arith.constant 0 : index
    %c22 = arith.constant 22 : index
    %166 = vector.load %arg19[%c0_184, %c22] : memref<20x72xf32, #tpu.memory_space<vmem>>, vector<20x32xf32>
    %c440 = arith.constant 440 : index
    %c0_185 = arith.constant 0 : index
    %167 = vector.load %arg20[%c440, %c0_185] : memref<820x32xf32, #tpu.memory_space<vmem>>, vector<20x32xf32>
    tpu.vector_store %arg20[%c440, %c0_185], %166 {strides = array<i32>} : memref<820x32xf32, #tpu.memory_space<vmem>>, vector<20x32xf32>,
    %c0_186 = arith.constant 0 : index
    %c23 = arith.constant 23 : index
    %168 = vector.load %arg19[%c0_186, %c23] : memref<20x72xf32, #tpu.memory_space<vmem>>, vector<20x32xf32>
    %c460 = arith.constant 460 : index
    %c0_187 = arith.constant 0 : index
    %169 = vector.load %arg20[%c460, %c0_187] : memref<820x32xf32, #tpu.memory_space<vmem>>, vector<20x32xf32>
    tpu.vector_store %arg20[%c460, %c0_187], %168 {strides = array<i32>} : memref<820x32xf32, #tpu.memory_space<vmem>>, vector<20x32xf32>,
    %c0_188 = arith.constant 0 : index
    %c24_189 = arith.constant 24 : index
    %170 = vector.load %arg19[%c0_188, %c24_189] : memref<20x72xf32, #tpu.memory_space<vmem>>, vector<20x32xf32>
    %c480 = arith.constant 480 : index
    %c0_190 = arith.constant 0 : index
    %171 = vector.load %arg20[%c480, %c0_190] : memref<820x32xf32, #tpu.memory_space<vmem>>, vector<20x32xf32>
    tpu.vector_store %arg20[%c480, %c0_190], %170 {strides = array<i32>} : memref<820x32xf32, #tpu.memory_space<vmem>>, vector<20x32xf32>,
    %c0_191 = arith.constant 0 : index
    %c25 = arith.constant 25 : index
    %172 = vector.load %arg19[%c0_191, %c25] : memref<20x72xf32, #tpu.memory_space<vmem>>, vector<20x32xf32>
    %c500 = arith.constant 500 : index
    %c0_192 = arith.constant 0 : index
    %173 = vector.load %arg20[%c500, %c0_192] : memref<820x32xf32, #tpu.memory_space<vmem>>, vector<20x32xf32>
    tpu.vector_store %arg20[%c500, %c0_192], %172 {strides = array<i32>} : memref<820x32xf32, #tpu.memory_space<vmem>>, vector<20x32xf32>,
    %c0_193 = arith.constant 0 : index
    %c26 = arith.constant 26 : index
    %174 = vector.load %arg19[%c0_193, %c26] : memref<20x72xf32, #tpu.memory_space<vmem>>, vector<20x32xf32>
    %c520 = arith.constant 520 : index
    %c0_194 = arith.constant 0 : index
    %175 = vector.load %arg20[%c520, %c0_194] : memref<820x32xf32, #tpu.memory_space<vmem>>, vector<20x32xf32>
    tpu.vector_store %arg20[%c520, %c0_194], %174 {strides = array<i32>} : memref<820x32xf32, #tpu.memory_space<vmem>>, vector<20x32xf32>,
    %c0_195 = arith.constant 0 : index
    %c27 = arith.constant 27 : index
    %176 = vector.load %arg19[%c0_195, %c27] : memref<20x72xf32, #tpu.memory_space<vmem>>, vector<20x32xf32>
    %c540 = arith.constant 540 : index
    %c0_196 = arith.constant 0 : index
    %177 = vector.load %arg20[%c540, %c0_196] : memref<820x32xf32, #tpu.memory_space<vmem>>, vector<20x32xf32>
    tpu.vector_store %arg20[%c540, %c0_196], %176 {strides = array<i32>} : memref<820x32xf32, #tpu.memory_space<vmem>>, vector<20x32xf32>,
    %c0_197 = arith.constant 0 : index
    %c28 = arith.constant 28 : index
    %178 = vector.load %arg19[%c0_197, %c28] : memref<20x72xf32, #tpu.memory_space<vmem>>, vector<20x32xf32>
    %c560 = arith.constant 560 : index
    %c0_198 = arith.constant 0 : index
    %179 = vector.load %arg20[%c560, %c0_198] : memref<820x32xf32, #tpu.memory_space<vmem>>, vector<20x32xf32>
    tpu.vector_store %arg20[%c560, %c0_198], %178 {strides = array<i32>} : memref<820x32xf32, #tpu.memory_space<vmem>>, vector<20x32xf32>,
    %c0_199 = arith.constant 0 : index
    %c29 = arith.constant 29 : index
    %180 = vector.load %arg19[%c0_199, %c29] : memref<20x72xf32, #tpu.memory_space<vmem>>, vector<20x32xf32>
    %c580 = arith.constant 580 : index
    %c0_200 = arith.constant 0 : index
    %181 = vector.load %arg20[%c580, %c0_200] : memref<820x32xf32, #tpu.memory_space<vmem>>, vector<20x32xf32>
    tpu.vector_store %arg20[%c580, %c0_200], %180 {strides = array<i32>} : memref<820x32xf32, #tpu.memory_space<vmem>>, vector<20x32xf32>,
    %c0_201 = arith.constant 0 : index
    %c30 = arith.constant 30 : index
    %182 = vector.load %arg19[%c0_201, %c30] : memref<20x72xf32, #tpu.memory_space<vmem>>, vector<20x32xf32>
    %c600 = arith.constant 600 : index
    %c0_202 = arith.constant 0 : index
    %183 = vector.load %arg20[%c600, %c0_202] : memref<820x32xf32, #tpu.memory_space<vmem>>, vector<20x32xf32>
    tpu.vector_store %arg20[%c600, %c0_202], %182 {strides = array<i32>} : memref<820x32xf32, #tpu.memory_space<vmem>>, vector<20x32xf32>,
    %c0_203 = arith.constant 0 : index
    %c31 = arith.constant 31 : index
    %184 = vector.load %arg19[%c0_203, %c31] : memref<20x72xf32, #tpu.memory_space<vmem>>, vector<20x32xf32>
    %c620 = arith.constant 620 : index
    %c0_204 = arith.constant 0 : index
    %185 = vector.load %arg20[%c620, %c0_204] : memref<820x32xf32, #tpu.memory_space<vmem>>, vector<20x32xf32>
    tpu.vector_store %arg20[%c620, %c0_204], %184 {strides = array<i32>} : memref<820x32xf32, #tpu.memory_space<vmem>>, vector<20x32xf32>,
    %c0_205 = arith.constant 0 : index
    %c32 = arith.constant 32 : index
    %186 = vector.load %arg19[%c0_205, %c32] : memref<20x72xf32, #tpu.memory_space<vmem>>, vector<20x32xf32>
    %c640 = arith.constant 640 : index
    %c0_206 = arith.constant 0 : index
    %187 = vector.load %arg20[%c640, %c0_206] : memref<820x32xf32, #tpu.memory_space<vmem>>, vector<20x32xf32>
    tpu.vector_store %arg20[%c640, %c0_206], %186 {strides = array<i32>} : memref<820x32xf32, #tpu.memory_space<vmem>>, vector<20x32xf32>,
    %c0_207 = arith.constant 0 : index
    %c33 = arith.constant 33 : index
    %188 = vector.load %arg19[%c0_207, %c33] : memref<20x72xf32, #tpu.memory_space<vmem>>, vector<20x32xf32>
    %c660 = arith.constant 660 : index
    %c0_208 = arith.constant 0 : index
    %189 = vector.load %arg20[%c660, %c0_208] : memref<820x32xf32, #tpu.memory_space<vmem>>, vector<20x32xf32>
    tpu.vector_store %arg20[%c660, %c0_208], %188 {strides = array<i32>} : memref<820x32xf32, #tpu.memory_space<vmem>>, vector<20x32xf32>,
    %c0_209 = arith.constant 0 : index
    %c34 = arith.constant 34 : index
    %190 = vector.load %arg19[%c0_209, %c34] : memref<20x72xf32, #tpu.memory_space<vmem>>, vector<20x32xf32>
    %c680 = arith.constant 680 : index
    %c0_210 = arith.constant 0 : index
    %191 = vector.load %arg20[%c680, %c0_210] : memref<820x32xf32, #tpu.memory_space<vmem>>, vector<20x32xf32>
    tpu.vector_store %arg20[%c680, %c0_210], %190 {strides = array<i32>} : memref<820x32xf32, #tpu.memory_space<vmem>>, vector<20x32xf32>,
    %c0_211 = arith.constant 0 : index
    %c35 = arith.constant 35 : index
    %192 = vector.load %arg19[%c0_211, %c35] : memref<20x72xf32, #tpu.memory_space<vmem>>, vector<20x32xf32>
    %c700 = arith.constant 700 : index
    %c0_212 = arith.constant 0 : index
    %193 = vector.load %arg20[%c700, %c0_212] : memref<820x32xf32, #tpu.memory_space<vmem>>, vector<20x32xf32>
    tpu.vector_store %arg20[%c700, %c0_212], %192 {strides = array<i32>} : memref<820x32xf32, #tpu.memory_space<vmem>>, vector<20x32xf32>,
    %c0_213 = arith.constant 0 : index
    %c36_214 = arith.constant 36 : index
    %194 = vector.load %arg19[%c0_213, %c36_214] : memref<20x72xf32, #tpu.memory_space<vmem>>, vector<20x32xf32>
    %c720 = arith.constant 720 : index
    %c0_215 = arith.constant 0 : index
    %195 = vector.load %arg20[%c720, %c0_215] : memref<820x32xf32, #tpu.memory_space<vmem>>, vector<20x32xf32>
    tpu.vector_store %arg20[%c720, %c0_215], %194 {strides = array<i32>} : memref<820x32xf32, #tpu.memory_space<vmem>>, vector<20x32xf32>,
    %c0_216 = arith.constant 0 : index
    %c37 = arith.constant 37 : index
    %196 = vector.load %arg19[%c0_216, %c37] : memref<20x72xf32, #tpu.memory_space<vmem>>, vector<20x32xf32>
    %c740 = arith.constant 740 : index
    %c0_217 = arith.constant 0 : index
    %197 = vector.load %arg20[%c740, %c0_217] : memref<820x32xf32, #tpu.memory_space<vmem>>, vector<20x32xf32>
    tpu.vector_store %arg20[%c740, %c0_217], %196 {strides = array<i32>} : memref<820x32xf32, #tpu.memory_space<vmem>>, vector<20x32xf32>,
    %c0_218 = arith.constant 0 : index
    %c38 = arith.constant 38 : index
    %198 = vector.load %arg19[%c0_218, %c38] : memref<20x72xf32, #tpu.memory_space<vmem>>, vector<20x32xf32>
    %c760 = arith.constant 760 : index
    %c0_219 = arith.constant 0 : index
    %199 = vector.load %arg20[%c760, %c0_219] : memref<820x32xf32, #tpu.memory_space<vmem>>, vector<20x32xf32>
    tpu.vector_store %arg20[%c760, %c0_219], %198 {strides = array<i32>} : memref<820x32xf32, #tpu.memory_space<vmem>>, vector<20x32xf32>,
    %c0_220 = arith.constant 0 : index
    %c39 = arith.constant 39 : index
    %200 = vector.load %arg19[%c0_220, %c39] : memref<20x72xf32, #tpu.memory_space<vmem>>, vector<20x32xf32>
    %c780 = arith.constant 780 : index
    %c0_221 = arith.constant 0 : index
    %201 = vector.load %arg20[%c780, %c0_221] : memref<820x32xf32, #tpu.memory_space<vmem>>, vector<20x32xf32>
    tpu.vector_store %arg20[%c780, %c0_221], %200 {strides = array<i32>} : memref<820x32xf32, #tpu.memory_space<vmem>>, vector<20x32xf32>,
    %c0_222 = arith.constant 0 : index
    %c40_223 = arith.constant 40 : index
    %202 = vector.load %arg19[%c0_222, %c40_223] : memref<20x72xf32, #tpu.memory_space<vmem>>, vector<20x32xf32>
    %c800 = arith.constant 800 : index
    %c0_224 = arith.constant 0 : index
    %203 = vector.load %arg20[%c800, %c0_224] : memref<820x32xf32, #tpu.memory_space<vmem>>, vector<20x32xf32>
    tpu.vector_store %arg20[%c800, %c0_224], %202 {strides = array<i32>} : memref<820x32xf32, #tpu.memory_space<vmem>>, vector<20x32xf32>,
    %c0_225 = arith.constant 0 : index
    %c0_226 = arith.constant 0 : index
    %204 = vector.load %arg8[%c0_225, %c0_226] : memref<12x820xbf16, #tpu.memory_space<vmem>>, vector<12x820xbf16>
    %c0_227 = arith.constant 0 : index
    %c0_228 = arith.constant 0 : index
    %205 = vector.load %arg20[%c0_227, %c0_228] : memref<820x32xf32, #tpu.memory_space<vmem>>, vector<820x32xf32>
    %206 = arith.truncf %205 : vector<820x32xf32> to vector<820x32xbf16>
    %cst_229 = arith.constant dense<0.000000e+00> : vector<12x32xf32>
    %207 = tpu.matmul %204, %206, %cst_229 {dimension_numbers = #tpu.dot_dimension_numbers<[1], [0], [0], [1], [0, 0, 1, 1], [], []>} : vector<12x820xbf16>, vector<820x32xbf16>, vector<12x32xf32> -> vector<12x32xf32>
    %c0_230 = arith.constant 0 : index
    %c0_231 = arith.constant 0 : index
    %c0_232 = arith.constant 0 : index
    %208 = vector.load %arg9[%c0_230, %c0_231, %c0_232] : memref<1x12x32xf32, #tpu.memory_space<vmem>>, vector<1x12x32xf32>
    %209 = vector.shape_cast %208 : vector<1x12x32xf32> to vector<12x32xf32>
    %210 = vector.shape_cast %207 : vector<12x32xf32> to vector<1x12x32xf32>
    tpu.vector_store %arg9[%c0_230, %c0_231, %c0_232], %210 {strides = array<i32>} : memref<1x12x32xf32, #tpu.memory_space<vmem>>, vector<1x12x32xf32>,
    return
  }
  func.func @transform_0(%arg0: i32) -> (i32, i32, i32) {
    %c0_i32 = arith.constant 0 : i32
    %c0_i32_0 = arith.constant 0 : i32
    %c0_i32_1 = arith.constant 0 : i32
    return %arg0, %c0_i32, %c0_i32_0 : i32, i32, i32
  }
  func.func @transform_1(%arg0: i32) -> (i32, i32) {
    %c0_i32 = arith.constant 0 : i32
    %c0_i32_0 = arith.constant 0 : i32
    %c0_i32_1 = arith.constant 0 : i32
    return %c0_i32, %c0_i32_0 : i32, i32
  }
  func.func @transform_2(%arg0: i32) -> (i32, i32) {
    %c0_i32 = arith.constant 0 : i32
    %c0_i32_0 = arith.constant 0 : i32
    %c0_i32_1 = arith.constant 0 : i32
    return %c0_i32, %c0_i32_0 : i32, i32
  }
  func.func @transform_3(%arg0: i32) -> (i32, i32) {
    %c0_i32 = arith.constant 0 : i32
    %c0_i32_0 = arith.constant 0 : i32
    %c0_i32_1 = arith.constant 0 : i32
    return %c0_i32, %c0_i32_0 : i32, i32
  }
  func.func @transform_4(%arg0: i32) -> (i32, i32) {
    %c0_i32 = arith.constant 0 : i32
    %c0_i32_0 = arith.constant 0 : i32
    %c0_i32_1 = arith.constant 0 : i32
    return %c0_i32, %c0_i32_0 : i32, i32
  }
  func.func @transform_5(%arg0: i32) -> (i32, i32) {
    %c0_i32 = arith.constant 0 : i32
    %c0_i32_0 = arith.constant 0 : i32
    %c0_i32_1 = arith.constant 0 : i32
    return %c0_i32, %c0_i32_0 : i32, i32
  }
  func.func @transform_6(%arg0: i32) -> (i32, i32) {
    %c0_i32 = arith.constant 0 : i32
    %c0_i32_0 = arith.constant 0 : i32
    %c0_i32_1 = arith.constant 0 : i32
    return %c0_i32, %c0_i32_0 : i32, i32
  }
  func.func @transform_7(%arg0: i32) -> (i32, i32) {
    %c0_i32 = arith.constant 0 : i32
    %c0_i32_0 = arith.constant 0 : i32
    %c0_i32_1 = arith.constant 0 : i32
    return %c0_i32, %c0_i32_0 : i32, i32
  }
  func.func @transform_8(%arg0: i32) -> (i32, i32, i32) {
    %c0_i32 = arith.constant 0 : i32
    %c0_i32_0 = arith.constant 0 : i32
    %c0_i32_1 = arith.constant 0 : i32
    return %arg0, %c0_i32, %c0_i32_0 : i32, i32, i32
  }
  func.func @transform_9(%arg0: i32) -> (i32, i32, i32) {
    %c0_i32 = arith.constant 0 : i32
    %c0_i32_0 = arith.constant 0 : i32
    %c0_i32_1 = arith.constant 0 : i32
    return %arg0, %c0_i32, %c0_i32_0 : i32, i32, i32
  }
  func.func @transform_10(%arg0: i32) -> (i32, i32, i32) {
    %c0_i32 = arith.constant 0 : i32
    %c0_i32_0 = arith.constant 0 : i32
    %c0_i32_1 = arith.constant 0 : i32
    return %arg0, %c0_i32, %c0_i32_0 : i32, i32, i32
  }
  func.func @transform_11(%arg0: i32) -> (i32, i32, i32) {
    %c0_i32 = arith.constant 0 : i32
    %c0_i32_0 = arith.constant 0 : i32
    %c0_i32_1 = arith.constant 0 : i32
    return %arg0, %c0_i32, %c0_i32_0 : i32, i32, i32
  }
}

</mosaic_0001>

<bundles_post_ra>
// kernel: ae_csnmf2_forward.1
= control target key start
LH: loop header
LB: loop body
LE: loop exit
PB: predicated region body
PF: predicated region fallthrough
CT: control target
= control target key end

     0   :  { %s2685_s17 = smov 0   ;;  %s3284_s0 = inlined_call_operand.vmem [shape: f32[2,12,32], index: 0, kind: input, shape index: {}]   ;;  %s3285_s1 = inlined_call_operand.vmem [shape: bf16[12,180], index: 1, kind: input, shape index: {}]   ;;  %s3286_s2 = inlined_call_operand.vmem [shape: f32[12,1], index: 2, kind: input, shape index: {}]   ;;  %s3287_s3 = inlined_call_operand.vmem [shape: bf16[12,36], index: 3, kind: input, shape index: {}]   ;;  %s3288_s4 = inlined_call_operand.vmem [shape: f32[12,1], index: 4, kind: input, shape index: {}]   ;;  %s3289_s5 = inlined_call_operand.vmem [shape: bf16[20,36], index: 5, kind: input, shape index: {}]   ;;  %s3290_s6 = inlined_call_operand.vmem [shape: f32[20,1], index: 6, kind: input, shape index: {}]   ;;  %s3291_s7 = inlined_call_operand.vmem [shape: bf16[12,820], index: 7, kind: input, shape index: {}]   ;;  %s3292_s8 = inlined_call_operand.vmem [shape: f32[2,12,32], index: 8, kind: output, shape index: {0}]   ;;  %s3293_s9 = inlined_call_operand.vmem [shape: f32[2,20,32], index: 9, kind: output, shape index: {1}]   ;;  %s3294_s10 = inlined_call_operand.vmem [shape: f32[2,1,32], index: 10, kind: output, shape index: {2}]   ;;  %s3295_s11 = inlined_call_operand.vmem [shape: f32[2,20,1], index: 11, kind: output, shape index: {3}]  }
   0x1   :  { %3365 = sst [smem:[#allocation11_spill]] %s3284_s0 }
   0x2   :  { %3366 = sst [smem:[#allocation12_spill]] %s3285_s1 }
   0x3   :  { %3367 = sst [smem:[#allocation13_spill]] %s3286_s2 }
   0x4   :  { %3368 = sst [smem:[#allocation14_spill]] %s3287_s3 }
   0x5   :  { %3369 = sst [smem:[#allocation15_spill]] %s3288_s4 }
   0x6   :  { %3370 = sst [smem:[#allocation16_spill]] %s3289_s5 }
   0x7   :  { %3371 = sst [smem:[#allocation17_spill]] %s3290_s6 }
   0x8   :  { %3372 = sst [smem:[#allocation18_spill]] %s3293_s9 }
   0x9   :  { %3373 = sst [smem:[#allocation19_spill]] %s3294_s10 }
   0xa   :  { %3374 = sst [smem:[#allocation20_spill]] %s3295_s11 }
   0xb LB: > { %3375 = sst [smem:[#allocation10_spill]] %s2577_s17  ;;  %s2333_s18 = sadd.s32 4294967295, %s2577_s17   ;;  %s2577_s17 = sphi %s2685_s17, %s22_s17  }
   0xc   : > { %p2337_p0 = scmp.ge.s32.totalorder %s2577_s17, 1  ;;  %p344_p1 = scmp.lt.s32.totalorder %s2577_s17, 3 }
   0xe   : > { %p345_p2 = pnand %p2337_p0, %p344_p1 }
   0xf   : > { %p397_p3 = scmp.lt.s32.totalorder (!%p345_p2), %s2333_s18, 1  ;;  %vm423_vm0 = vcmask (!%p345_p2), 375808   ;;  %vm425_vm1 = vcmask (!%p345_p2), 371712   ;;  %v2579_v0 = vmov (!%p345_p2), 0.0   ;;  %s3376_s0 = sld [smem:[#allocation11_spill]] (!%p345_p2)  ;;  %vm435_vm2 = vcmask (!%p345_p2), 318520  }
  0x10   : > { %348 = sbr.rel (%p345_p2) target bundleno = 2223 (0x8af), region = 52  ;;  %424 = vst.msk [vmem:[#allocation2] sm:$0xff] (!%p345_p2), %vm423_vm0, %v2579_v0  ;;  %2445 = vmatprep.subr.bf16.mxu1 (!%p345_p2), %v2579_v0  ;;  %s2580_s23 = smov (!%p345_p2), 7   ;;  %vm437_vm3 = vcmask (!%p345_p2), 314424   ;;  %v2581_v5 = vmov (!%p345_p2), 0   ;;  %vm441_vm4 = vcmask (!%p345_p2), 261120  }
  0x11   : > { %426 = vst.msk [vmem:[#allocation2 + $0x8] sm:$0xf] (!%p345_p2), %vm425_vm1, %v2579_v0  ;;  %679 = vmatprep.subr.bf16.mxu0 (!%p345_p2), %v2581_v5  ;;  %2533 = vset.pattern.permute.xlu0 (!%p345_p2), %v2581_v5  ;;  %s3335_s24 = smov (!%p345_p2), 126   ;;  %s3316_s25 = smov (!%p345_p2), 127   ;;  %vm443_vm5 = vcmask (!%p345_p2), 257024   ;;  %vm671_vm6 = vcmask (!%p345_p2), 424960  }
  0x12   : > { %2534 = vset.pattern.permute.xlu1 (!%p345_p2), %v2581_v5  ;;  %s3338_s26 = smov (!%p345_p2), 125   ;;  %s3340_s27 = smov (!%p345_p2), 124   ;;  %vm675_vm7 = vcmask (!%p345_p2), 1041408   ;;  %vm722_vm8 = vcmask (!%p345_p2), 277504   ;;  %vm724_vm9 = vcmask (!%p345_p2), 273408   ;;  %vm734_vm10 = vcmask (!%p345_p2), 269320  }
  0x13   : > { %s3297_s28 = smov (!%p345_p2), 123   ;;  %s3350_s29 = smov (!%p345_p2), 122   ;;  %723 = vst.msk [vmem:[#allocation4] sm:$0xff] (!%p345_p2), %vm722_vm8, %v2579_v0  ;;  %843 = vst.msk [vmem:[#allocation6] sm:$0xff] (!%p345_p2), %vm722_vm8, %v2579_v0  ;;  %vm736_vm11 = vcmask (!%p345_p2), 265224   ;;  %vm2597_vm12 = vmmov (!%p345_p2), 0  }
  0x14   : > { %s3334_s30 = smov (!%p345_p2), 121   ;;  %s3314_s12 = smov (!%p345_p2), 120   ;;  %725 = vst.msk [vmem:[#allocation4 + $0x8] sm:$0xf] (!%p345_p2), %vm724_vm9, %v2579_v0  ;;  %844 = vst.msk [vmem:[#allocation6 + $0x8] sm:$0xf] (!%p345_p2), %vm724_vm9, %v2579_v0  ;;  %2451 = vmatprep.mubr.msk.bf16.mxu1 (!%p345_p2), %vm2597_vm12, %v2579_v0 }
  0x15   : > { %s3301_s13 = smov (!%p345_p2), 119   ;;  %s3339_s14 = smov (!%p345_p2), 118   ;;  %vm793_vm13 = vcmask (!%p345_p2), 293888   ;;  %vm1072_vm14 = vcmask (!%p345_p2), 584704   ;;  %vm1069_vm15 = vcmask (!%p345_p2), 588800   ;;  %vm1062_vm0 = vcmask (!%p345_p2), 253952  }
  0x16   : > { %s3299_s15 = smov (!%p345_p2), 117   ;;  %s3310_s16 = smov (!%p345_p2), 116   ;;  %1073 = vst.msk [vmem:[#allocation8 + $0x10] sm:$0xf] (!%p345_p2), %vm1072_vm14, %v2579_v0  ;;  %vm1089_vm1 = vcmask (!%p345_p2), 421024  }
  0x17   : > { %s3429_s18 = smov (!%p397_p3, %s2333_s18), 1  ;;  %s3305_s20 = smov 115   ;;  %1071 = vst.msk [vmem:[#allocation8 + $0x8] sm:$0xff] %vm1069_vm15, %v2579_v0  ;;  %1070 = vst.msk [vmem:[#allocation8] sm:$0xff] %vm1069_vm15, %v2579_v0 }
  0x18   : > { %s3296_s19 = sshll.u32 %s3429_s18, 4  ;;  %s3303_s21 = smov 114  }
  0x19   : > { %s401_s22 = scalar_lea.vmem %s3376_s0, %s3296_s19  ;;  %s3377_s1 = sld [smem:[#allocation12_spill]] }
  0x1a   : > { %v421_v1 = vld [vmem:[%s401_s22] sm:$0xff]  ;;  %v422_v2 = vld [vmem:[%s401_s22 + $0x8] sm:$0xf]  ;;  %s3378_s2 = sld [smem:[#allocation13_spill]]  ;;  %s3379_s4 = sld [smem:[#allocation15_spill]] }
  0x1b   : > { %429 = vrot.lane.b32.xlu0 %v421_v1, %s2580_s23  ;;  %s3380_s3 = sld [smem:[#allocation14_spill]]  ;;  %s3381_s6 = sld [smem:[#allocation17_spill]] }
  0x1c   : > { %s3382_s5 = sld [smem:[#allocation16_spill]]  ;;  %s3383_s9 = sld [smem:[#allocation18_spill]] }
  0x1d   : > { %s3384_s10 = sld [smem:[#allocation19_spill]]  ;;  %s3341_s22 = smov 109  }
  0x1e   : > { %s3401_s0 = smov 92   ;;  %s3411_s17 = smov 98  }
  0x1f   : > { %431 = vrot.lane.b32.xlu0 %v422_v2, %s2580_s23  ;;  %v2537_v21 = vld [vmem:[%s3377_s1 + $0x4] ss:$8 sps:$4 sm:$0x3f]   ;;  %s3385_s23 = smov 119   ;;  %s3412_s11 = smov 121  }
  0x20   : > { %2346 = vmatprep.mubr.msk.bf16.mxu0 %vm671_vm6, %v2537_v21  ;;  %v650_v23 = vld [vmem:[%s3378_s2] sm:$0xff]  ;;  %v651_v24 = vld [vmem:[%s3378_s2 + $0x8] sm:$0xf]  ;;  %s3403_s2 = smov 89  }
  0x8d   : > { %v430_v3 = vpop.permute.xlu0 %429 }
  0x8e   : > { %436 = vst.msk [vmem:[#allocation2] sm:$0xff] %vm435_vm2, %v430_v3  ;;  %vm1086_vm2 = vcmask 425120  }
  0x91   : > { %v432_v4 = vpop.permute.xlu0 %431 }
  0x92   : > { %438 = vst.msk [vmem:[#allocation2 + $0x8] sm:$0xf] %vm437_vm3, %v432_v4  ;;  %vm1064_vm3 = vcmask 7168  }
  0x95   : > { %v439_v6 = vld [vmem:[#allocation2] sm:$0xff] }
  0x96   : > { %461 = vrot.lane.b32.xlu0 %v439_v6, %s3335_s24  ;;  %449 = vrot.lane.b32.xlu1 %v439_v6, %s3316_s25  ;;  %442 = vst.msk [vmem:[#allocation3] sm:$0xff] %vm441_vm4, %v439_v6 }
  0x99   : > { %v440_v7 = vld [vmem:[#allocation2 + $0x8] sm:$0xf] }
  0x9a   : > { %v446_v8 = vld [vmem:[#allocation2 + $0x8] sm:$0xf]  ;;  %473 = vrot.lane.b32.xlu0 %v439_v6, %s3338_s26  ;;  %444 = vst.msk [vmem:[#allocation3 + $0x8] sm:$0xf] %vm443_vm5, %v440_v7 }
  0x9b   : > { %451 = vrot.lane.b32.xlu1 %v446_v8, %s3316_s25  ;;  %v458_v9 = vld [vmem:[#allocation2 + $0x8] sm:$0xf] }
  0x9c   : > { %v470_v10 = vld [vmem:[#allocation2 + $0x8] sm:$0xf] }
  0x9d   : > { %v482_v11 = vld [vmem:[#allocation2 + $0x8] sm:$0xf]  ;;  %v615_v31 = vld [vmem:[#allocation3] sm:$0xff] }
  0x9e   : > { %485 = vrot.lane.b32.xlu0 %v439_v6, %s3340_s27  ;;  %v494_v12 = vld [vmem:[#allocation2 + $0x8] sm:$0xf] }
  0x9f   : > { %463 = vrot.lane.b32.xlu1 %v458_v9, %s3335_s24  ;;  %v506_v13 = vld [vmem:[#allocation2 + $0x8] sm:$0xf] }
  0xa0   : > { %v518_v14 = vld [vmem:[#allocation2 + $0x8] sm:$0xf] }
  0xa1   : > { %v530_v15 = vld [vmem:[#allocation2 + $0x8] sm:$0xf] }
  0xa2   : > { %497 = vrot.lane.b32.xlu0 %v439_v6, %s3297_s28  ;;  %v542_v16 = vld [vmem:[#allocation2 + $0x8] sm:$0xf] }
  0xa3   : > { %475 = vrot.lane.b32.xlu1 %v470_v10, %s3338_s26  ;;  %v554_v17 = vld [vmem:[#allocation2 + $0x8] sm:$0xf] }
  0xa4   : > { %v566_v18 = vld [vmem:[#allocation2 + $0x8] sm:$0xf] }
  0xa5   : > { %v578_v19 = vld [vmem:[#allocation2 + $0x8] sm:$0xf] }
  0xa6   : > { %509 = vrot.lane.b32.xlu0 %v439_v6, %s3350_s29  ;;  %v590_v20 = vld [vmem:[#allocation2 + $0x8] sm:$0xf] }
  0xa7   : > { %487 = vrot.lane.b32.xlu1 %v482_v11, %s3340_s27  ;;  %v602_v22 = vld [vmem:[#allocation2 + $0x8] sm:$0xf] }
  0xaa   : > { %521 = vrot.lane.b32.xlu0 %v439_v6, %s3334_s30 }
  0xab   : > { %499 = vrot.lane.b32.xlu1 %v494_v12, %s3297_s28  ;;  %s2598_s28 = smov 20  }
  0xae   : > { %533 = vrot.lane.b32.xlu0 %v439_v6, %s3314_s12 }
  0xaf   : > { %511 = vrot.lane.b32.xlu1 %v506_v13, %s3350_s29 }
  0xb2   : > { %545 = vrot.lane.b32.xlu0 %v439_v6, %s3301_s13 }
  0xb3   : > { %523 = vrot.lane.b32.xlu1 %v518_v14, %s3334_s30 }
  0xb6   : > { %557 = vrot.lane.b32.xlu0 %v439_v6, %s3339_s14 }
  0xb7   : > { %535 = vrot.lane.b32.xlu1 %v530_v15, %s3314_s12 }
  0xba   : > { %569 = vrot.lane.b32.xlu0 %v439_v6, %s3299_s15 }
  0xbb   : > { %547 = vrot.lane.b32.xlu1 %v542_v16, %s3301_s13  ;;  %s2596_s13 = smov 1  }
  0xbe   : > { %581 = vrot.lane.b32.xlu0 %v439_v6, %s3310_s16 }
  0xbf   : > { %559 = vrot.lane.b32.xlu1 %v554_v17, %s3339_s14 }
  0xc2   : > { %593 = vrot.lane.b32.xlu0 %v439_v6, %s3305_s20 }
  0xc3   : > { %571 = vrot.lane.b32.xlu1 %v566_v18, %s3299_s15  ;;  %s3386_s15 = smov 117  }
  0xc6   : > { %605 = vrot.lane.b32.xlu0 %v439_v6, %s3303_s21 }
  0xc7   : > { %583 = vrot.lane.b32.xlu1 %v578_v19, %s3310_s16 }
  0xca   : > { %654 = vperm.xlu0 %2533, %v650_v23  }
  0xcb   : > { %595 = vrot.lane.b32.xlu1 %v590_v20, %s3305_s20  ;;  %s3320_s20 = smov 106  }
  0xcf   : > { %607 = vrot.lane.b32.xlu1 %v602_v22, %s3303_s21  ;;  %s414_s21 = scalar_lea.vmem %s3384_s10, %s3429_s18  ;;  %s3409_s10 = smov 100  }
  0xd3   : > { %659 = vperm.xlu1 %2534, %v651_v24  }
 0x108   : > { %v450_v25 = vpop.permute.xlu1 %449  ;;  %v462_v26 = vpop.permute.xlu0 %461 }
 0x109   : > { %455 = vst.msk [vmem:[#allocation3 + $0xc] sm:$0xff] %vm441_vm4, %v450_v25  ;;  %467 = vst.msk [vmem:[#allocation3 + $0x18] sm:$0xff] %vm441_vm4, %v462_v26 }
 0x10c   : > { %v474_v28 = vpop.permute.xlu0 %473 }
 0x10d   : > { %v452_v27 = vpop.permute.xlu1 %451  ;;  %479 = vst.msk [vmem:[#allocation3 + $0x24] sm:$0xff] %vm441_vm4, %v474_v28 }
 0x10e   : > { %456 = vst.msk [vmem:[#allocation3 + $0x14] sm:$0xf] %vm443_vm5, %v452_v27  ;;  %v2535_v27 = vld [vmem:[%s3377_s1] ss:$8 sps:$4 sm:$0x3f]   ;;  %s3402_s1 = smov 95  }
 0x110   : > { %v486_v30 = vpop.permute.xlu0 %485  ;;  %v616_v32 = vld [vmem:[#allocation3 + $0x8] sm:$0xff]  ;;  %v618_v37 = vld [vmem:[#allocation3 + $0x18] sm:$0xff] }
 0x111   : > { %v464_v29 = vpop.permute.xlu1 %463  ;;  %491 = vst.msk [vmem:[#allocation3 + $0x30] sm:$0xff] %vm441_vm4, %v486_v30  ;;  %v638_v33 = vpack.c.bf16 %v616_v32, %v615_v31 }
 0x112   : > { %468 = vst.msk [vmem:[#allocation3 + $0x20] sm:$0xf] %vm443_vm5, %v464_v29 }
 0x113   : > { %680 = vmatpush1.bf16.msra.mxu0 %v638_v33 }
 0x114   : > { %v498_v35 = vpop.permute.xlu0 %497  ;;  %681 = vmatprep.subr.bf16.mxu0 %v2581_v5 }
 0x115   : > { %v476_v34 = vpop.permute.xlu1 %475  ;;  %v617_v36 = vld [vmem:[#allocation3 + $0x10] sm:$0xff]  ;;  %503 = vst.msk [vmem:[#allocation3 + $0x3c] sm:$0xff] %vm441_vm4, %v498_v35 }
 0x116   : > { %480 = vst.msk [vmem:[#allocation3 + $0x2c] sm:$0xf] %vm443_vm5, %v476_v34  ;;  %v639_v38 = vpack.c.bf16 %v618_v37, %v617_v36 }
 0x118   : > { %682 = vmatpush1.bf16.msra.mxu0 %v639_v38  ;;  %v510_v40 = vpop.permute.xlu0 %509  ;;  %v621_v48 = vld [vmem:[#allocation3 + $0x30] sm:$0xff] }
 0x119   : > { %v488_v39 = vpop.permute.xlu1 %487  ;;  %683 = vmatprep.subr.bf16.mxu0 %v2581_v5  ;;  %515 = vst.msk [vmem:[#allocation3 + $0x48] sm:$0xff] %vm441_vm4, %v510_v40  ;;  %v619_v43 = vld [vmem:[#allocation3 + $0x20] sm:$0xff] }
 0x11a   : > { %492 = vst.msk [vmem:[#allocation3 + $0x38] sm:$0xf] %vm443_vm5, %v488_v39 }
 0x11c   : > { %v522_v42 = vpop.permute.xlu0 %521 }
 0x11d   : > { %v500_v41 = vpop.permute.xlu1 %499  ;;  %v620_v44 = vld [vmem:[#allocation3 + $0x28] sm:$0xff]  ;;  %527 = vst.msk [vmem:[#allocation3 + $0x54] sm:$0xff] %vm441_vm4, %v522_v42 }
 0x11e   : > { %504 = vst.msk [vmem:[#allocation3 + $0x44] sm:$0xf] %vm443_vm5, %v500_v41  ;;  %v640_v45 = vpack.c.bf16 %v620_v44, %v619_v43  ;;  %v776_v43 = vld [vmem:[%s3379_s4] sm:$0xff]  ;;  %v777_v44 = vld [vmem:[%s3379_s4 + $0x8] sm:$0xf]  ;;  %s3406_s4 = smov 112  }
 0x120   : > { %684 = vmatpush1.bf16.msra.mxu0 %v640_v45  ;;  %v534_v47 = vpop.permute.xlu0 %533  ;;  %v624_v54 = vld [vmem:[#allocation3 + $0x48] sm:$0xff] }
 0x121   : > { %v512_v46 = vpop.permute.xlu1 %511  ;;  %685 = vmatprep.subr.bf16.mxu0 %v2581_v5  ;;  %v622_v49 = vld [vmem:[#allocation3 + $0x38] sm:$0xff]  ;;  %539 = vst.msk [vmem:[#allocation3 + $0x60] sm:$0xff] %vm441_vm4, %v534_v47 }
 0x122   : > { %516 = vst.msk [vmem:[#allocation3 + $0x50] sm:$0xf] %vm443_vm5, %v512_v46  ;;  %v641_v50 = vpack.c.bf16 %v622_v49, %v621_v48 }
 0x124   : > { %686 = vmatpush1.bf16.msra.mxu0 %v641_v50  ;;  %v546_v52 = vpop.permute.xlu0 %545 }
 0x125   : > { %v524_v51 = vpop.permute.xlu1 %523  ;;  %687 = vmatprep.subr.bf16.mxu0 %v2581_v5  ;;  %v623_v53 = vld [vmem:[#allocation3 + $0x40] sm:$0xff]  ;;  %551 = vst.msk [vmem:[#allocation3 + $0x6c] sm:$0xff] %vm441_vm4, %v546_v52 }
 0x126   : > { %528 = vst.msk [vmem:[#allocation3 + $0x5c] sm:$0xf] %vm443_vm5, %v524_v51  ;;  %v642_v55 = vpack.c.bf16 %v624_v54, %v623_v53 }
 0x128   : > { %688 = vmatpush1.bf16.msra.mxu0 %v642_v55  ;;  %v558_v57 = vpop.permute.xlu0 %557  ;;  %v627_v2 = vld [vmem:[#allocation3 + $0x60] sm:$0xff] }
 0x129   : > { %v536_v56 = vpop.permute.xlu1 %535  ;;  %689 = vmatprep.subr.bf16.mxu0 %v2581_v5  ;;  %563 = vst.msk [vmem:[#allocation3 + $0x78] sm:$0xff] %vm441_vm4, %v558_v57  ;;  %v625_v60 = vld [vmem:[#allocation3 + $0x50] sm:$0xff] }
 0x12a   : > { %540 = vst.msk [vmem:[#allocation3 + $0x68] sm:$0xf] %vm443_vm5, %v536_v56 }
 0x12c   : > { %v570_v59 = vpop.permute.xlu0 %569 }
 0x12d   : > { %v548_v58 = vpop.permute.xlu1 %547  ;;  %v626_v61 = vld [vmem:[#allocation3 + $0x58] sm:$0xff]  ;;  %575 = vst.msk [vmem:[#allocation3 + $0x84] sm:$0xff] %vm441_vm4, %v570_v59 }
 0x12e   : > { %552 = vst.msk [vmem:[#allocation3 + $0x74] sm:$0xf] %vm443_vm5, %v548_v58  ;;  %v643_v62 = vpack.c.bf16 %v626_v61, %v625_v60  ;;  %v2538_v58 = vld [vmem:[%s3380_s3] sm:$0x3f]   ;;  %s3405_s3 = smov 91  }
 0x130   : > { %690 = vmatpush1.bf16.msra.mxu0 %v643_v62  ;;  %v582_v1 = vpop.permute.xlu0 %581  ;;  %v630_v9 = vld [vmem:[#allocation3 + $0x78] sm:$0xff] }
 0x131   : > { %v560_v63 = vpop.permute.xlu1 %559  ;;  %691 = vmatprep.subr.bf16.mxu0 %v2581_v5  ;;  %v628_v3 = vld [vmem:[#allocation3 + $0x68] sm:$0xff]  ;;  %587 = vst.msk [vmem:[#allocation3 + $0x90] sm:$0xff] %vm441_vm4, %v582_v1 }
 0x132   : > { %564 = vst.msk [vmem:[#allocation3 + $0x80] sm:$0xf] %vm443_vm5, %v560_v63  ;;  %v644_v4 = vpack.c.bf16 %v628_v3, %v627_v2 }
 0x134   : > { %692 = vmatpush1.bf16.msra.mxu0 %v644_v4  ;;  %v594_v7 = vpop.permute.xlu0 %593 }
 0x135   : > { %v572_v6 = vpop.permute.xlu1 %571  ;;  %693 = vmatprep.subr.bf16.mxu0 %v2581_v5  ;;  %v629_v8 = vld [vmem:[#allocation3 + $0x70] sm:$0xff]  ;;  %599 = vst.msk [vmem:[#allocation3 + $0x9c] sm:$0xff] %vm441_vm4, %v594_v7 }
 0x136   : > { %576 = vst.msk [vmem:[#allocation3 + $0x8c] sm:$0xf] %vm443_vm5, %v572_v6  ;;  %v645_v10 = vpack.c.bf16 %v630_v9, %v629_v8 }
 0x138   : > { %694 = vmatpush1.bf16.msra.mxu0 %v645_v10  ;;  %v606_v12 = vpop.permute.xlu0 %605  ;;  %v633_v18 = vld [vmem:[#allocation3 + $0x90] sm:$0xff] }
 0x139   : > { %v584_v11 = vpop.permute.xlu1 %583  ;;  %695 = vmatprep.subr.bf16.mxu0 %v2581_v5  ;;  %611 = vst.msk [vmem:[#allocation3 + $0xa8] sm:$0xff] %vm441_vm4, %v606_v12  ;;  %v631_v14 = vld [vmem:[#allocation3 + $0x80] sm:$0xff] }
 0x13a   : > { %588 = vst.msk [vmem:[#allocation3 + $0x98] sm:$0xf] %vm443_vm5, %v584_v11 }
 0x13d   : > { %v596_v13 = vpop.permute.xlu1 %595  ;;  %v632_v15 = vld [vmem:[#allocation3 + $0x88] sm:$0xff] }
 0x13e   : > { %600 = vst.msk [vmem:[#allocation3 + $0xa4] sm:$0xf] %vm443_vm5, %v596_v13  ;;  %v646_v16 = vpack.c.bf16 %v632_v15, %v631_v14  ;;  %v894_v13 = vld [vmem:[%s3381_s6] sm:$0xff]  ;;  %v895_v14 = vld [vmem:[%s3381_s6 + $0x8] sm:$0xff] }
 0x13f   : > { %v2539_v15 = vld [vmem:[%s3382_s5] sm:$0xff]  }
 0x140   : > { %696 = vmatpush1.bf16.msra.mxu0 %v646_v16  ;;  %v636_v22 = vld [vmem:[#allocation3 + $0xa8] sm:$0xff]  ;;  %v896_v16 = vld [vmem:[%s3381_s6 + $0x10] sm:$0xf]  ;;  %s3407_s6 = smov 104  }
 0x141   : > { %v608_v17 = vpop.permute.xlu1 %607  ;;  %697 = vmatprep.subr.bf16.mxu0 %v2581_v5  ;;  %v634_v19 = vld [vmem:[#allocation3 + $0x98] sm:$0xff] }
 0x142   : > { %612 = vst.msk [vmem:[#allocation3 + $0xb0] sm:$0xf] %vm443_vm5, %v608_v17  ;;  %v647_v20 = vpack.c.bf16 %v634_v19, %v633_v18 }
 0x144   : > { %698 = vmatpush1.bf16.msra.mxu0 %v647_v20 }
 0x145   : > { %699 = vmatprep.subr.bf16.mxu0 %v2581_v5  ;;  %v635_v21 = vld [vmem:[#allocation3 + $0xa0] sm:$0xff] }
 0x146   : > { %v648_v23 = vpack.c.bf16 %v636_v22, %v635_v21 }
 0x148   : > { %700 = vmatpush1.bf16.msra.mxu0 %v648_v23 }
 0x149   : > { %701 = vmatprep.subr.bf16.mxu0 %v2581_v5  ;;  %v637_v24 = vld [vmem:[#allocation3 + $0xb0] sm:$0xf]  ;;  %v655_v5 = vpop.permute.xlu0 %654 }
 0x14a   : > { %v649_v25 = vpack.c.bf16 %v637_v24, %v637_v24 }
 0x14c   : > { %v677_v26 = vsel %vm675_vm7, %v649_v25, 0 }
 0x14d   : > { %702 = vmatpush1.bf16.msra.mxu0 %v677_v26 }
 0x150   : > { %712 = vmatmul.mubr.bf16.vlgmr.msra.gmra.mrb[0].mxu0 %v2535_v27 }
 0x152   : > { %v660_v29 = vpop.permute.xlu1 %659 }
 0x223   : > { %v713_v28 = vpop.f32.mrb[0].mxu0 }
 0x224   : > { %v714_v30 = vadd.f32 %v713_v28, %v655_v5  ;;  %v715_v31 = vpop.f32.mrb[1].mxu0 }
 0x225   : > { %v716_v32 = vpop.f32.mrb[2].mxu0 }
 0x226   : > { %v720_v33 = vmax.f32 %v714_v30, 0.0  ;;  %v717_v34 = vadd.f32 %v716_v32, %v660_v29  ;;  %v718_v35 = vpop.f32.mrb[3].mxu0  ;;  %v2540_v29 = vld [vmem:[%s3382_s5 + $0x8] ss:$0 sps:$4 sm:$0x33]   ;;  %s3362_s5 = smov 97  }
 0x228   : > { %v721_v36 = vmax.f32 %v717_v34, 0.0  ;;  %728 = vrot.lane.b32.xlu1 %v720_v33, %s2596_s13 }
 0x22a   : > { %730 = vrot.lane.b32.xlu0 %v721_v36, %s2596_s13 }
 0x29a   : > { %v729_v37 = vpop.permute.xlu1 %728 }
 0x29b   : > { %735 = vst.msk [vmem:[#allocation4] sm:$0xff] %vm734_vm10, %v729_v37 }
 0x29c   : > { %v731_v38 = vpop.permute.xlu0 %730 }
 0x29d   : > { %737 = vst.msk [vmem:[#allocation4 + $0x8] sm:$0xf] %vm736_vm11, %v731_v38 }
 0x2a2   : > { %v738_v39 = vld [vmem:[#allocation4] sm:$0xff] }
 0x2a3   : > { %740 = vst.msk [vmem:[#allocation5] sm:$0xff] %vm441_vm4, %v738_v39  ;;  %746 = vrot.lane.b32.xlu1 %v738_v39, %s3316_s25 }
 0x2a4   : > { %v739_v40 = vld [vmem:[#allocation4 + $0x8] sm:$0xf] }
 0x2a5   : > { %v743_v41 = vld [vmem:[#allocation4 + $0x8] sm:$0xf]  ;;  %741 = vst.msk [vmem:[#allocation5 + $0x8] sm:$0xf] %vm443_vm5, %v739_v40 }
 0x2a6   : > { %748 = vrot.lane.b32.xlu0 %v743_v41, %s3316_s25  ;;  %v755_v42 = vld [vmem:[#allocation4 + $0x8] sm:$0xf] }
 0x2a7   : > { %758 = vrot.lane.b32.xlu1 %v738_v39, %s3335_s24 }
 0x2aa   : > { %760 = vrot.lane.b32.xlu0 %v755_v42, %s3335_s24  ;;  %v768_v49 = vld [vmem:[#allocation5] sm:$0xff] }
 0x2ab   : > { %780 = vperm.xlu1 %2534, %v776_v43  }
 0x2ae   : > { %785 = vperm.xlu0 %2533, %v777_v44  }
 0x315   : > { %v747_v45 = vpop.permute.xlu1 %746 }
 0x316   : > { %752 = vst.msk [vmem:[#allocation5 + $0xc] sm:$0xff] %vm441_vm4, %v747_v45 }
 0x318   : > { %v749_v46 = vpop.permute.xlu0 %748 }
 0x319   : > { %753 = vst.msk [vmem:[#allocation5 + $0x14] sm:$0xf] %vm443_vm5, %v749_v46  ;;  %v759_v47 = vpop.permute.xlu1 %758 }
 0x31a   : > { %764 = vst.msk [vmem:[#allocation5 + $0x18] sm:$0xff] %vm441_vm4, %v759_v47 }
 0x31c   : > { %v761_v48 = vpop.permute.xlu0 %760 }
 0x31d   : > { %765 = vst.msk [vmem:[#allocation5 + $0x20] sm:$0xf] %vm443_vm5, %v761_v48  ;;  %v769_v50 = vld [vmem:[#allocation5 + $0x8] sm:$0xff] }
 0x31e   : > { %v773_v51 = vpack.c.bf16 %v769_v50, %v768_v49 }
 0x320   : > { %2446 = vmatpush3.bf16.msra.mxu1 %v773_v51  ;;  %v770_v52 = vld [vmem:[#allocation5 + $0x10] sm:$0xff] }
 0x321   : > { %2447 = vmatprep.subr.bf16.mxu1 %v2579_v0  ;;  %v771_v53 = vld [vmem:[#allocation5 + $0x18] sm:$0xff] }
 0x322   : > { %v774_v54 = vpack.c.bf16 %v771_v53, %v770_v52 }
 0x324   : > { %v772_v55 = vld [vmem:[#allocation5 + $0x20] sm:$0xf]  ;;  %2448 = vmatpush3.bf16.msra.mxu1 %v774_v54 }
 0x325   : > { %v775_v56 = vpack.c.bf16 %v772_v55, %v772_v55  ;;  %2449 = vmatprep.subr.bf16.mxu1 %v2579_v0 }
 0x327   : > { %v798_v57 = vsel %vm675_vm7, %v775_v56, 0 }
 0x328   : > { %2450 = vmatpush3.bf16.msra.mxu1 %v798_v57 }
 0x32a   : > { %v781_v59 = vpop.permute.xlu1 %780 }
 0x32b   : > { %2452 = vmatmul.mubr.msk.bf16.vlgmr.msra.gmra.mrb[0].mxu1 %vm793_vm13, %v2538_v58 }
 0x32c   : > { %2461 = vmatprep.mubr.msk.bf16.mxu1 %vm793_vm13, %v2539_v15 }
 0x32d   : > { %v786_v63 = vpop.permute.xlu0 %785 }
 0x3fe   : > { %v834_v60 = vpop.f32.mrb[0].mxu1 }
 0x3ff   : > { %v835_v61 = vadd.f32 %v834_v60, %v781_v59  ;;  %v2453_v62 = vpop.f32.mrb[1].mxu1 }
 0x400   : > { %v837_v1 = vpop.f32.mrb[2].mxu1 }
 0x401   : > { %v841_v2 = vmax.f32 %v835_v61, 0.0  ;;  %v838_v3 = vadd.f32 %v837_v1, %v786_v63  ;;  %v2454_v4 = vpop.f32.mrb[3].mxu1 }
 0x403   : > { %v842_v6 = vmax.f32 %v838_v3, 0.0  ;;  %847 = vrot.lane.b32.xlu1 %v841_v2, %s2596_s13 }
 0x405   : > { %849 = vrot.lane.b32.xlu0 %v842_v6, %s2596_s13  ;;  %s3307_s13 = smul.u32 24, %s3429_s18 }
 0x407   : > { %s411_s19 = scalar_lea.vmem %s3383_s9, %s3307_s13  ;;  %s3318_s13 = smov 105  }
 0x408   : > { %s3408_s9 = smov 90  }
 0x475   : > { %v848_v7 = vpop.permute.xlu1 %847 }
 0x476   : > { %853 = vst.msk [vmem:[#allocation6] sm:$0xff] %vm734_vm10, %v848_v7 }
 0x477   : > { %v850_v8 = vpop.permute.xlu0 %849 }
 0x478   : > { %854 = vst.msk [vmem:[#allocation6 + $0x8] sm:$0xf] %vm736_vm11, %v850_v8 }
 0x47d   : > { %v855_v9 = vld [vmem:[#allocation6] sm:$0xff] }
 0x47e   : > { %857 = vst.msk [vmem:[#allocation7] sm:$0xff] %vm441_vm4, %v855_v9  ;;  %863 = vrot.lane.b32.xlu1 %v855_v9, %s3316_s25 }
 0x47f   : > { %v856_v10 = vld [vmem:[#allocation6 + $0x8] sm:$0xf] }
 0x480   : > { %v860_v11 = vld [vmem:[#allocation6 + $0x8] sm:$0xf]  ;;  %858 = vst.msk [vmem:[#allocation7 + $0x8] sm:$0xf] %vm443_vm5, %v856_v10 }
 0x481   : > { %865 = vrot.lane.b32.xlu0 %v860_v11, %s3316_s25  ;;  %v872_v12 = vld [vmem:[#allocation6 + $0x8] sm:$0xf] }
 0x482   : > { %875 = vrot.lane.b32.xlu1 %v855_v9, %s3335_s24 }
 0x485   : > { %877 = vrot.lane.b32.xlu0 %v872_v12, %s3335_s24  ;;  %v886_v21 = vld [vmem:[#allocation7] sm:$0xff] }
 0x486   : > { %899 = vperm.xlu1 %2534, %v894_v13  }
 0x489   : > { %904 = vperm.xlu0 %2533, %v895_v14  }
 0x48a   : > { %909 = vperm.xlu1 %2534, %v896_v16  }
 0x4f0   : > { %v864_v17 = vpop.permute.xlu1 %863 }
 0x4f1   : > { %869 = vst.msk [vmem:[#allocation7 + $0xc] sm:$0xff] %vm441_vm4, %v864_v17 }
 0x4f3   : > { %v866_v18 = vpop.permute.xlu0 %865 }
 0x4f4   : > { %870 = vst.msk [vmem:[#allocation7 + $0x14] sm:$0xf] %vm443_vm5, %v866_v18  ;;  %v876_v19 = vpop.permute.xlu1 %875 }
 0x4f5   : > { %881 = vst.msk [vmem:[#allocation7 + $0x18] sm:$0xff] %vm441_vm4, %v876_v19 }
 0x4f7   : > { %v878_v20 = vpop.permute.xlu0 %877 }
 0x4f8   : > { %882 = vst.msk [vmem:[#allocation7 + $0x20] sm:$0xf] %vm443_vm5, %v878_v20  ;;  %v887_v22 = vld [vmem:[#allocation7 + $0x8] sm:$0xff] }
 0x4f9   : > { %v891_v23 = vpack.c.bf16 %v887_v22, %v886_v21 }
 0x4fb   : > { %2455 = vmatprep.subr.bf16.mxu1 %v891_v23  ;;  %v888_v24 = vld [vmem:[#allocation7 + $0x10] sm:$0xff] }
 0x4fc   : > { %2456 = vmatpush3.bf16.msra.mxu1 %v891_v23  ;;  %v889_v25 = vld [vmem:[#allocation7 + $0x18] sm:$0xff] }
 0x4fd   : > { %v892_v26 = vpack.c.bf16 %v889_v25, %v888_v24 }
 0x4ff   : > { %v890_v27 = vld [vmem:[#allocation7 + $0x20] sm:$0xf]  ;;  %2457 = vmatprep.subr.bf16.mxu1 %v892_v26 }
 0x500   : > { %v893_v5 = vpack.c.bf16 %v890_v27, %v890_v27  ;;  %2458 = vmatpush3.bf16.msra.mxu1 %v892_v26 }
 0x502   : > { %2477 = vmatprep.subr.msk.bf16.mxu1 %vm675_vm7, %v893_v5  ;;  %v927_v28 = vsel %vm675_vm7, %v893_v5, 0 }
 0x504   : > { %2460 = vmatpush3.bf16.msra.mxu1 %v927_v28 }
 0x505   : > { %v900_v30 = vpop.permute.xlu1 %899 }
 0x507   : > { %2462 = vmatmul.mubr.msk.bf16.vlgmr.msra.gmra.mrb[4].mxu1 %vm793_vm13, %v2540_v29 }
 0x508   : > { %v905_v37 = vpop.permute.xlu0 %904 }
 0x509   : > { %v910_v31 = vpop.permute.xlu1 %909 }
 0x5da   : > { %v2463_v32 = vpop.f32.mrb[4].mxu1 }
 0x5db   : > { %v972_v33 = vadd.f32 %v2463_v32, %v910_v31  ;;  %v963_v34 = vpop.f32.mrb[5].mxu1 }
 0x5dc   : > { %v964_v35 = vadd.f32 %v963_v34, %v900_v30  ;;  %v2464_v36 = vpop.f32.mrb[6].mxu1 }
 0x5dd   : > { %v2865_v38 = vmax.f32 %v972_v33, 0.0  ;;  %v966_v39 = vpop.f32.mrb[7].mxu1 }
 0x5de   : > { %v2867_v40 = vmax.f32 %v964_v35, 0.0  ;;  %v967_v41 = vadd.f32 %v966_v39, %v905_v37 }
 0x5df   : > { %1081 = vrot.lane.b32.xlu0 %v2865_v38, %s2598_s28  ;;  %982 = vst.msk [vmem:[%s411_s19 + $0x10] sm:$0xf] %vm443_vm5, %v2865_v38  ;;  %v2892_v46 = vsel %vm443_vm5, %v2865_v38, 0.0 }
 0x5e0   : > { %v2872_v42 = vmax.f32 %v967_v41, 0.0  ;;  %980 = vst.msk [vmem:[%s411_s19] sm:$0xff] %vm441_vm4, %v2867_v40  ;;  %v2883_v44 = vsel %vm441_vm4, %v2867_v40, 0.0 }
 0x5e2   : > { %1079 = vrot.lane.b32.xlu1 %v2872_v42, %s2598_s28  ;;  %v2879_v43 = vsel %vm441_vm4, %v2872_v42, 0.0  ;;  %981 = vst.msk [vmem:[%s411_s19 + $0x8] sm:$0xff] %vm441_vm4, %v2872_v42  ;;  %s3308_s19 = smov 103  }
 0x5e3   : > { %1077 = vrot.lane.b32.xlu0 %v2867_v40, %s2598_s28  ;;  %v985_v45 = vadd.f32 %v2879_v43, %v2883_v44  ;;  %s3312_s28 = smov 96  }
 0x5e5   : > { %v987_v47 = vadd.f32 %v2892_v46, %v985_v45 }
 0x5e7   : > { %v988_v48 = vrot.slane %v987_v47, 4 }
 0x5e9   : > { %v989_v49 = vadd.f32 %v988_v48, %v987_v47 }
 0x5eb   : > { %v990_v50 = vrot.slane %v989_v49, 2 }
 0x5ed   : > { %v991_v51 = vadd.f32 %v990_v50, %v989_v49 }
 0x5ef   : > { %v992_v52 = vrot.slane %v991_v51, 1 }
 0x5f1   : > { %v993_v53 = vadd.f32 %v992_v52, %v991_v51 }
 0x5f3   : > { %v994_v54 = vadd.f32 1e-07, %v993_v53 }
 0x5f5   : > { %2551 = vrcp.f32 %v994_v54 }
 0x5ff   : > { %v2552_v55 = vpop.eup %2551 }
 0x600   : > { %v996_v56 = vmul.f32 %v2552_v55, %v2867_v40  ;;  %v997_v57 = vmul.f32 %v2552_v55, %v2872_v42  ;;  %v998_v58 = vmul.f32 %v2552_v55, %v2865_v38 }
 0x602   : > { %v999_v59 = vadd.f32 1e-07, %v996_v56  ;;  %v1000_v60 = vadd.f32 1e-07, %v997_v57  ;;  %v1001_v61 = vadd.f32 1e-07, %v998_v58 }
 0x604   : > { %2553 = vlog2.f32 %v999_v59 }
 0x605   : > { %2555 = vlog2.f32 %v1000_v60 }
 0x606   : > { %2557 = vlog2.f32 %v1001_v61 }
 0x60e   : > { %v2554_v62 = vpop.eup %2553 }
 0x60f   : > { %v2556_v63 = vpop.eup %2555  ;;  %v1003_v1 = vmul.f32 0.6931472, %v2554_v62 }
 0x610   : > { %v2558_v2 = vpop.eup %2557  ;;  %v1005_v3 = vmul.f32 0.6931472, %v2556_v63 }
 0x611   : > { %v1007_v4 = vmul.f32 0.6931472, %v2558_v2  ;;  %v1008_v6 = vmul.f32 %v1003_v1, %v996_v56 }
 0x612   : > { %v1009_v7 = vmul.f32 %v1005_v3, %v997_v57 }
 0x613   : > { %v1010_v8 = vmul.f32 %v1007_v4, %v998_v58  ;;  %v1011_v9 = vsel %vm441_vm4, %v1008_v6, 0.0 }
 0x614   : > { %v1012_v10 = vsel %vm441_vm4, %v1009_v7, 0.0 }
 0x615   : > { %v1013_v11 = vadd.f32 %v1012_v10, %v1011_v9  ;;  %v1014_v12 = vsel %vm443_vm5, %v1010_v8, 0.0 }
 0x617   : > { %v1015_v13 = vadd.f32 %v1014_v12, %v1013_v11 }
 0x619   : > { %v1016_v14 = vrot.slane %v1015_v13, 4 }
 0x61b   : > { %v1017_v15 = vadd.f32 %v1016_v14, %v1015_v13 }
 0x61d   : > { %v1018_v16 = vrot.slane %v1017_v15, 2 }
 0x61f   : > { %v1019_v17 = vadd.f32 %v1018_v16, %v1017_v15 }
 0x621   : > { %v1020_v18 = vrot.slane %v1019_v17, 1 }
 0x623   : > { %v1021_v19 = vadd.f32 %v1020_v18, %v1019_v17 }
 0x625   : > { %v1022_v20 = vsub.f32 0.0, %v1021_v19 }
 0x627   : > { %1063 = vst.msk [vmem:[%s414_s21] sm:$0x1] %vm1062_vm0, %v1022_v20  ;;  %s3387_s21 = smov 115  }
 0x651   : > { %v1082_v21 = vpop.permute.xlu0 %1081 }
 0x652   : > { %1090 = vst.msk [vmem:[#allocation8 + $0x10] sm:$0xf] %vm1089_vm1, %v1082_v21 }
 0x654   : > { %v1080_v22 = vpop.permute.xlu1 %1079 }
 0x655   : > { %1088 = vst.msk [vmem:[#allocation8 + $0x8] sm:$0xff] %vm1086_vm2, %v1080_v22  ;;  %v1078_v23 = vpop.permute.xlu0 %1077 }
 0x656   : > { %1087 = vst.msk [vmem:[#allocation8] sm:$0xff] %vm1086_vm2, %v1078_v23 }
 0x659   : > { %v1207_v24 = vld [vmem:[#allocation8 + $0x10] sm:$0xf] }
 0x65a   : > { %v1189_v25 = vld [vmem:[#allocation8 + $0x10] sm:$0xf]  ;;  %1215 = vrot.lane.b32.xlu1 %v1207_v24, %s3334_s30 }
 0x65b   : > { %1197 = vrot.lane.b32.xlu0 %v1189_v25, %s3350_s29  ;;  %v1135_v26 = vld [vmem:[#allocation8 + $0x10] sm:$0xf] }
 0x65c   : > { %v1099_v27 = vld [vmem:[#allocation8 + $0x10] sm:$0xf]  ;;  %v2917_v32 = vld [vmem:[#allocation8 + $0x8] sm:$0xff] }
 0x65d   : > { %v1261_v5 = vld [vmem:[#allocation8 + $0x10] sm:$0xf]  ;;  %v2911_v29 = vld [vmem:[#allocation8] sm:$0xff]  ;;  %1095 = vst.msk [vmem:[#allocation9 + $0x8] sm:$0xff] %vm441_vm4, %v2917_v32 }
 0x65e   : > { %1143 = vrot.lane.b32.xlu1 %v1135_v26, %s3338_s26  ;;  %v1225_v28 = vld [vmem:[#allocation8 + $0x10] sm:$0xf]  ;;  %1094 = vst.msk [vmem:[#allocation9] sm:$0xff] %vm441_vm4, %v2911_v29 }
 0x65f   : > { %1107 = vrot.lane.b32.xlu0 %v1099_v27, %s3316_s25  ;;  %v1423_v30 = vld [vmem:[#allocation8 + $0x10] sm:$0xf]  ;;  %s3389_s25 = smov 114  }
 0x660   : > { %v1117_v31 = vld [vmem:[#allocation8 + $0x10] sm:$0xf] }
 0x661   : > { %v1093_v33 = vld [vmem:[#allocation8 + $0x10] sm:$0xf] }
 0x662   : > { %1269 = vrot.lane.b32.xlu1 %v1261_v5, %s3339_s14  ;;  %1096 = vst.msk [vmem:[#allocation9 + $0x10] sm:$0xf] %vm443_vm5, %v1093_v33  ;;  %v1153_v34 = vld [vmem:[#allocation8 + $0x10] sm:$0xf] }
 0x663   : > { %1233 = vrot.lane.b32.xlu0 %v1225_v28, %s3314_s12  ;;  %v1243_v35 = vld [vmem:[#allocation8 + $0x10] sm:$0xf]  ;;  %s3326_s12 = smov 93  }
 0x664   : > { %v1531_v36 = vld [vmem:[#allocation8 + $0x10] sm:$0xf] }
 0x665   : > { %v1297_v37 = vld [vmem:[#allocation8 + $0x10] sm:$0xf] }
 0x666   : > { %1431 = vrot.lane.b32.xlu1 %v1423_v30, %s3341_s22  ;;  %v1657_v39 = vld [vmem:[#allocation8 + $0x10] sm:$0xf] }
 0x667   : > { %1125 = vrot.lane.b32.xlu0 %v1117_v31, %s3335_s24  ;;  %v1279_v41 = vld [vmem:[#allocation8 + $0x10] sm:$0xf] }
 0x668   : > { %v1477_v45 = vld [vmem:[#allocation8 + $0x10] sm:$0xf] }
 0x669   : > { %v1315_v47 = vld [vmem:[#allocation8 + $0x10] sm:$0xf] }
 0x66a   : > { %1161 = vrot.lane.b32.xlu1 %v1153_v34, %s3340_s27  ;;  %v1495_v48 = vld [vmem:[#allocation8 + $0x10] sm:$0xf] }
 0x66b   : > { %1251 = vrot.lane.b32.xlu0 %v1243_v35, %s3385_s23  ;;  %v1171_v49 = vld [vmem:[#allocation8 + $0x10] sm:$0xf] }
 0x66c   : > { %v1567_v50 = vld [vmem:[#allocation8 + $0x10] sm:$0xf] }
 0x66d   : > { %v1441_v51 = vld [vmem:[#allocation8 + $0x10] sm:$0xf] }
 0x66e   : > { %1539 = vrot.lane.b32.xlu1 %v1531_v36, %s3308_s19  ;;  %s3388_s19 = smov 123   ;;  %v1711_v52 = vld [vmem:[#allocation8 + $0x10] sm:$0xf] }
 0x66f   : > { %1305 = vrot.lane.b32.xlu0 %v1297_v37, %s3310_s16  ;;  %s3322_s16 = smov 101   ;;  %v1333_v53 = vld [vmem:[#allocation8 + $0x10] sm:$0xf] }
 0x670   : > { %v1603_v54 = vld [vmem:[#allocation8 + $0x10] sm:$0xf] }
 0x671   : > { %v1459_v55 = vld [vmem:[#allocation8 + $0x10] sm:$0xf] }
 0x672   : > { %1665 = vrot.lane.b32.xlu1 %v1657_v39, %s3312_s28  ;;  %s3324_s28 = smov 108   ;;  %v1783_v56 = vld [vmem:[#allocation8 + $0x10] sm:$0xf] }
 0x673   : > { %1287 = vrot.lane.b32.xlu0 %v1279_v41, %s3386_s15  ;;  %v1351_v57 = vld [vmem:[#allocation8 + $0x10] sm:$0xf] }
 0x674   : > { %v1549_v58 = vld [vmem:[#allocation8 + $0x10] sm:$0xf] }
 0x675   : > { %v1675_v59 = vld [vmem:[#allocation8 + $0x10] sm:$0xf] }
 0x676   : > { %1485 = vrot.lane.b32.xlu1 %v1477_v45, %s3320_s20  ;;  %s3330_s20 = smov 107   ;;  %v1369_v60 = vld [vmem:[#allocation8 + $0x10] sm:$0xf] }
 0x677   : > { %1323 = vrot.lane.b32.xlu0 %v1315_v47, %s3387_s21  ;;  %v1693_v61 = vld [vmem:[#allocation8 + $0x10] sm:$0xf] }
 0x678   : > { %v1387_v62 = vld [vmem:[#allocation8 + $0x10] sm:$0xf] }
 0x679   : > { %v1513_v63 = vld [vmem:[#allocation8 + $0x10] sm:$0xf] }
 0x67a   : > { %1503 = vrot.lane.b32.xlu1 %v1495_v48, %s3318_s13  ;;  %s3328_s13 = smov 99   ;;  %v1585_v1 = vld [vmem:[#allocation8 + $0x10] sm:$0xf] }
 0x67b   : > { %1179 = vrot.lane.b32.xlu0 %v1171_v49, %s3388_s19  ;;  %v1405_v2 = vld [vmem:[#allocation8 + $0x10] sm:$0xf] }
 0x67c   : > { %v1765_v3 = vld [vmem:[#allocation8 + $0x10] sm:$0xf] }
 0x67d   : > { %v1729_v4 = vld [vmem:[#allocation8 + $0x10] sm:$0xf] }
 0x67e   : > { %1575 = vrot.lane.b32.xlu1 %v1567_v50, %s3322_s16  ;;  %s3332_s16 = smov 89   ;;  %v1621_v6 = vld [vmem:[#allocation8 + $0x10] sm:$0xf] }
 0x67f   : > { %1449 = vrot.lane.b32.xlu0 %v1441_v51, %s3324_s28  ;;  %s3353_s28 = smov 113   ;;  %v1747_v7 = vld [vmem:[#allocation8 + $0x10] sm:$0xf]  ;;  %v2543_v51 = vld [vmem:[%s3291_s7 + $0x4] ss:$28 sps:$4 sm:$0x3f]  }
 0x680   : > { %2053 = vmatprep.mubr.bf16.mxu1 %v2543_v51 }
 0x682   : > { %1719 = vrot.lane.b32.xlu1 %v1711_v52, %s3326_s12  ;;  %s3361_s12 = smov 102  }
 0x683   : > { %1341 = vrot.lane.b32.xlu0 %v1333_v53, %s3389_s25 }
 0x686   : > { %1611 = vrot.lane.b32.xlu1 %v1603_v54, %s3328_s13  ;;  %s3348_s13 = smov 95  }
 0x687   : > { %1467 = vrot.lane.b32.xlu0 %v1459_v55, %s3330_s20  ;;  %s3336_s20 = smov 112  }
 0x68a   : > { %1791 = vrot.lane.b32.xlu1 %v1783_v56, %s3332_s16  ;;  %s3356_s16 = smov 94  }
 0x68b   : > { %1359 = vrot.lane.b32.xlu0 %v1351_v57, %s3353_s28 }
 0x68e   : > { %1211 = vrot.lane.b32.xlu1 %v2911_v29, %s3334_s30  ;;  %s3357_s30 = smov 111  }
 0x68f   : > { %1557 = vrot.lane.b32.xlu0 %v1549_v58, %s3361_s12 }
 0x692   : > { %1121 = vrot.lane.b32.xlu1 %v2911_v29, %s3335_s24  ;;  %s3344_s24 = smov 104  }
 0x693   : > { %1683 = vrot.lane.b32.xlu0 %v1675_v59, %s3348_s13  ;;  %s3392_s13 = smov 127  }
 0x696   : > { %1247 = vrot.lane.b32.xlu1 %v2911_v29, %s3385_s23 }
 0x697   : > { %1377 = vrot.lane.b32.xlu0 %v1369_v60, %s3336_s20  ;;  %s3342_s20 = smov 100  }
 0x69a   : > { %1139 = vrot.lane.b32.xlu1 %v2911_v29, %s3338_s26  ;;  %s3360_s26 = smov 110  }
 0x69b   : > { %1701 = vrot.lane.b32.xlu0 %v1693_v61, %s3356_s16 }
 0x69e   : > { %1265 = vrot.lane.b32.xlu1 %v2911_v29, %s3339_s14  ;;  %s3346_s14 = smov 90  }
 0x69f   : > { %1395 = vrot.lane.b32.xlu0 %v1387_v62, %s3357_s30 }
 0x6a2   : > { %1157 = vrot.lane.b32.xlu1 %v2911_v29, %s3340_s27  ;;  %s3358_s27 = smov 92  }
 0x6a3   : > { %1521 = vrot.lane.b32.xlu0 %v1513_v63, %s3344_s24  ;;  %s3354_s24 = smov 91  }
 0x6a6   : > { %1427 = vrot.lane.b32.xlu1 %v2911_v29, %s3341_s22  ;;  %s3351_s22 = smov 98  }
 0x6a7   : > { %1593 = vrot.lane.b32.xlu0 %v1585_v1, %s3342_s20  ;;  %s3390_s20 = smov 107  }
 0x6aa   : > { %1319 = vrot.lane.b32.xlu1 %v2911_v29, %s3387_s21 }
 0x6ab   : > { %1413 = vrot.lane.b32.xlu0 %v1405_v2, %s3360_s26 }
 0x6ae   : > { %1337 = vrot.lane.b32.xlu1 %v2911_v29, %s3389_s25 }
 0x6af   : > { %1773 = vrot.lane.b32.xlu0 %v1765_v3, %s3346_s14  ;;  %s3391_s14 = smov 106  }
 0x6b2   : > { %1193 = vrot.lane.b32.xlu1 %v2911_v29, %s3350_s29  ;;  %s3393_s29 = smov 101  }
 0x6b3   : > { %1737 = vrot.lane.b32.xlu0 %v1729_v4, %s3358_s27  ;;  %s3399_s27 = smov 96  }
 0x6b6   : > { %1463 = vrot.lane.b32.xlu1 %v2911_v29, %s3390_s20 }
 0x6b7   : > { %1629 = vrot.lane.b32.xlu0 %v1621_v6, %s3351_s22  ;;  %s3394_s22 = smov 120  }
 0x6ba   : > { %1355 = vrot.lane.b32.xlu1 %v2911_v29, %s3353_s28  ;;  %s3395_s28 = smov 93  }
 0x6bb   : > { %1755 = vrot.lane.b32.xlu0 %v1747_v7, %s3354_s24  ;;  %s3396_s24 = smov 108  }
 0x6be   : > { %1481 = vrot.lane.b32.xlu1 %v2911_v29, %s3391_s14 }
 0x6bf   : > { %1103 = vrot.lane.b32.xlu0 %v2911_v29, %s3392_s13 }
 0x6c2   : > { %1571 = vrot.lane.b32.xlu1 %v2911_v29, %s3393_s29 }
 0x6c3   : > { %1229 = vrot.lane.b32.xlu0 %v2911_v29, %s3394_s22 }
 0x6c6   : > { %1697 = vrot.lane.b32.xlu1 %v2911_v29, %s3356_s16  ;;  %s3397_s16 = smov 116  }
 0x6c7   : > { %1283 = vrot.lane.b32.xlu0 %v2911_v29, %s3386_s15 }
 0x6ca   : > { %1391 = vrot.lane.b32.xlu1 %v2911_v29, %s3357_s30  ;;  %s3398_s30 = smov 103  }
 0x6cb   : > { %1175 = vrot.lane.b32.xlu0 %v2911_v29, %s3388_s19 }
 0x6cc   : > { %v1216_v8 = vpop.permute.xlu1 %1215 }
 0x6cd   : > { %v1198_v9 = vpop.permute.xlu0 %1197  ;;  %1222 = vst.msk [vmem:[#allocation9 + $0x9c] sm:$0xf] %vm443_vm5, %v1216_v8  ;;  %v2546_v8 = vld [vmem:[%s3291_s7 + $0xc] ss:$28 sps:$4 sm:$0x3f]  }
 0x6ce   : > { %1204 = vst.msk [vmem:[#allocation9 + $0x88] sm:$0xf] %vm443_vm5, %v1198_v9  ;;  %1715 = vrot.lane.b32.xlu1 %v2911_v29, %s3395_s28  ;;  %2094 = vmatprep.mubr.bf16.mxu0 %v2546_v8 }
 0x6cf   : > { %1445 = vrot.lane.b32.xlu0 %v2911_v29, %s3396_s24 }
 0x6d0   : > { %v1144_v10 = vpop.permute.xlu1 %1143 }
 0x6d1   : > { %v1108_v11 = vpop.permute.xlu0 %1107  ;;  %1150 = vst.msk [vmem:[#allocation9 + $0x4c] sm:$0xf] %vm443_vm5, %v1144_v10 }
 0x6d2   : > { %1114 = vst.msk [vmem:[#allocation9 + $0x24] sm:$0xf] %vm443_vm5, %v1108_v11  ;;  %1409 = vrot.lane.b32.xlu1 %v2911_v29, %s3360_s26  ;;  %s3400_s26 = smov 99  }
 0x6d3   : > { %1301 = vrot.lane.b32.xlu0 %v2911_v29, %s3397_s16 }
 0x6d4   : > { %v1270_v12 = vpop.permute.xlu1 %1269 }
 0x6d5   : > { %v1234_v13 = vpop.permute.xlu0 %1233  ;;  %1276 = vst.msk [vmem:[#allocation9 + $0xd8] sm:$0xf] %vm443_vm5, %v1270_v12 }
 0x6d6   : > { %1240 = vst.msk [vmem:[#allocation9 + $0xb0] sm:$0xf] %vm443_vm5, %v1234_v13  ;;  %1535 = vrot.lane.b32.xlu1 %v2911_v29, %s3398_s30 }
 0x6d7   : > { %1661 = vrot.lane.b32.xlu0 %v2911_v29, %s3399_s27 }
 0x6d8   : > { %v1432_v14 = vpop.permute.xlu1 %1431 }
 0x6d9   : > { %v1126_v15 = vpop.permute.xlu0 %1125  ;;  %1438 = vst.msk [vmem:[#allocation9 + $0x18c] sm:$0xf] %vm443_vm5, %v1432_v14 }
 0x6da   : > { %1132 = vst.msk [vmem:[#allocation9 + $0x38] sm:$0xf] %vm443_vm5, %v1126_v15  ;;  %1607 = vrot.lane.b32.xlu1 %v2911_v29, %s3400_s26  ;;  %v1639_v15 = vld [vmem:[#allocation8 + $0x10] sm:$0xf] }
 0x6db   : > { %1553 = vrot.lane.b32.xlu0 %v2911_v29, %s3361_s12  ;;  %s3404_s12 = smov 105  }
 0x6dc   : > { %v1162_v16 = vpop.permute.xlu1 %1161 }
 0x6dd   : > { %v1252_v17 = vpop.permute.xlu0 %1251  ;;  %1168 = vst.msk [vmem:[#allocation9 + $0x60] sm:$0xf] %vm443_vm5, %v1162_v16 }
 0x6de   : > { %1258 = vst.msk [vmem:[#allocation9 + $0xc4] sm:$0xf] %vm443_vm5, %v1252_v17  ;;  %1733 = vrot.lane.b32.xlu1 %v2911_v29, %s3401_s0  ;;  %v1801_v17 = vld [vmem:[#allocation8 + $0x10] sm:$0xf] }
 0x6df   : > { %1679 = vrot.lane.b32.xlu0 %v2911_v29, %s3402_s1 }
 0x6e0   : > { %v1540_v18 = vpop.permute.xlu1 %1539 }
 0x6e1   : > { %v1306_v19 = vpop.permute.xlu0 %1305  ;;  %1546 = vst.msk [vmem:[#allocation9 + $0x204] sm:$0xf] %vm443_vm5, %v1540_v18 }
 0x6e2   : > { %1312 = vst.msk [vmem:[#allocation9 + $0x100] sm:$0xf] %vm443_vm5, %v1306_v19  ;;  %1787 = vrot.lane.b32.xlu1 %v2911_v29, %s3403_s2 }
 0x6e3   : > { %1499 = vrot.lane.b32.xlu0 %v2911_v29, %s3404_s12 }
 0x6e4   : > { %v1666_v20 = vpop.permute.xlu1 %1665 }
 0x6e5   : > { %v1288_v21 = vpop.permute.xlu0 %1287  ;;  %1672 = vst.msk [vmem:[#allocation9 + $0x290] sm:$0xf] %vm443_vm5, %v1666_v20 }
 0x6e6   : > { %1294 = vst.msk [vmem:[#allocation9 + $0xec] sm:$0xf] %vm443_vm5, %v1288_v21  ;;  %1751 = vrot.lane.b32.xlu1 %v2911_v29, %s3405_s3 }
 0x6e7   : > { %1373 = vrot.lane.b32.xlu0 %v2911_v29, %s3406_s4 }
 0x6e8   : > { %v1486_v22 = vpop.permute.xlu1 %1485 }
 0x6e9   : > { %v1324_v23 = vpop.permute.xlu0 %1323  ;;  %1492 = vst.msk [vmem:[#allocation9 + $0x1c8] sm:$0xf] %vm443_vm5, %v1486_v22 }
 0x6ea   : > { %1330 = vst.msk [vmem:[#allocation9 + $0x114] sm:$0xf] %vm443_vm5, %v1324_v23  ;;  %1643 = vrot.lane.b32.xlu1 %v2911_v29, %s3362_s5  ;;  %s3410_s5 = smov 122  }
 0x6eb   : > { %1517 = vrot.lane.b32.xlu0 %v2911_v29, %s3407_s6 }
 0x6ec   : > { %v1504_v24 = vpop.permute.xlu1 %1503 }
 0x6ed   : > { %v1180_v25 = vpop.permute.xlu0 %1179  ;;  %1510 = vst.msk [vmem:[#allocation9 + $0x1dc] sm:$0xf] %vm443_vm5, %v1504_v24 }
 0x6ee   : > { %1186 = vst.msk [vmem:[#allocation9 + $0x74] sm:$0xf] %vm443_vm5, %v1180_v25  ;;  %1769 = vrot.lane.b32.xlu1 %v2911_v29, %s3408_s9 }
 0x6ef   : > { %1589 = vrot.lane.b32.xlu0 %v2911_v29, %s3409_s10 }
 0x6f0   : > { %v1576_v26 = vpop.permute.xlu1 %1575 }
 0x6f1   : > { %v1450_v27 = vpop.permute.xlu0 %1449  ;;  %1582 = vst.msk [vmem:[#allocation9 + $0x22c] sm:$0xf] %vm443_vm5, %v1576_v26 }
 0x6f2   : > { %1456 = vst.msk [vmem:[#allocation9 + $0x1a0] sm:$0xf] %vm443_vm5, %v1450_v27  ;;  %1195 = vrot.lane.b32.xlu1 %v2917_v32, %s3410_s5  ;;  %s3413_s5 = smov 126  }
 0x6f3   : > { %1625 = vrot.lane.b32.xlu0 %v2911_v29, %s3411_s17 }
 0x6f4   : > { %v1720_v5 = vpop.permute.xlu1 %1719 }
 0x6f5   : > { %v1342_v28 = vpop.permute.xlu0 %1341  ;;  %1726 = vst.msk [vmem:[#allocation9 + $0x2cc] sm:$0xf] %vm443_vm5, %v1720_v5 }
 0x6f6   : > { %1348 = vst.msk [vmem:[#allocation9 + $0x128] sm:$0xf] %vm443_vm5, %v1342_v28  ;;  %1105 = vrot.lane.b32.xlu1 %v2917_v32, %s3392_s13  ;;  %s3415_s13 = smov 118  }
 0x6f7   : > { %1213 = vrot.lane.b32.xlu0 %v2917_v32, %s3412_s11  ;;  %s3414_s11 = smov 125  }
 0x6f8   : > { %v1612_v30 = vpop.permute.xlu1 %1611 }
 0x6f9   : > { %v1468_v31 = vpop.permute.xlu0 %1467  ;;  %1618 = vst.msk [vmem:[#allocation9 + $0x254] sm:$0xf] %vm443_vm5, %v1612_v30 }
 0x6fa   : > { %1474 = vst.msk [vmem:[#allocation9 + $0x1b4] sm:$0xf] %vm443_vm5, %v1468_v31  ;;  %1231 = vrot.lane.b32.xlu1 %v2917_v32, %s3394_s22  ;;  %s3416_s22 = smov 124  }
 0x6fb   : > { %1249 = vrot.lane.b32.xlu0 %v2917_v32, %s3385_s23  ;;  %s3417_s23 = smov 109  }
 0x6fc   : > { %v1792_v33 = vpop.permute.xlu1 %1791 }
 0x6fd   : > { %v1360_v34 = vpop.permute.xlu0 %1359  ;;  %1798 = vst.msk [vmem:[#allocation9 + $0x31c] sm:$0xf] %vm443_vm5, %v1792_v33 }
 0x6fe   : > { %1366 = vst.msk [vmem:[#allocation9 + $0x13c] sm:$0xf] %vm443_vm5, %v1360_v34  ;;  %1123 = vrot.lane.b32.xlu1 %v2917_v32, %s3413_s5 }
 0x6ff   : > { %1141 = vrot.lane.b32.xlu0 %v2917_v32, %s3414_s11 }
 0x700   : > { %v1212_v35 = vpop.permute.xlu1 %1211 }
 0x701   : > { %v1558_v36 = vpop.permute.xlu0 %1557  ;;  %1220 = vst.msk [vmem:[#allocation9 + $0x8c] sm:$0xff] %vm441_vm4, %v1212_v35 }
 0x702   : > { %1564 = vst.msk [vmem:[#allocation9 + $0x218] sm:$0xf] %vm443_vm5, %v1558_v36  ;;  %1285 = vrot.lane.b32.xlu1 %v2917_v32, %s3386_s15  ;;  %v1825_v36 = vld [vmem:[#allocation9] sm:$0xff] }
 0x703   : > { %1267 = vrot.lane.b32.xlu0 %v2917_v32, %s3415_s13  ;;  %s3425_s13 = smul.u32 24, %s3429_s18 }
 0x704   : > { %v1122_v37 = vpop.permute.xlu1 %1121 }
 0x705   : > { %v1684_v39 = vpop.permute.xlu0 %1683  ;;  %1130 = vst.msk [vmem:[#allocation9 + $0x28] sm:$0xff] %vm441_vm4, %v1122_v37  ;;  %v1826_v37 = vld [vmem:[#allocation9 + $0x8] sm:$0xff] }
 0x706   : > { %1690 = vst.msk [vmem:[#allocation9 + $0x2a4] sm:$0xf] %vm443_vm5, %v1684_v39  ;;  %1177 = vrot.lane.b32.xlu1 %v2917_v32, %s3388_s19 }
 0x707   : > { %1159 = vrot.lane.b32.xlu0 %v2917_v32, %s3416_s22 }
 0x708   : > { %v1248_v41 = vpop.permute.xlu1 %1247 }
 0x709   : > { %v1378_v45 = vpop.permute.xlu0 %1377  ;;  %1256 = vst.msk [vmem:[#allocation9 + $0xb4] sm:$0xff] %vm441_vm4, %v1248_v41 }
 0x70a   : > { %1384 = vst.msk [vmem:[#allocation9 + $0x150] sm:$0xf] %vm443_vm5, %v1378_v45  ;;  %1447 = vrot.lane.b32.xlu1 %v2917_v32, %s3396_s24  ;;  %s3426_s24 = sld [smem:[#allocation20_spill]] }
 0x70b   : > { %1429 = vrot.lane.b32.xlu0 %v2917_v32, %s3417_s23 }
 0x70c   : > { %v1140_v47 = vpop.permute.xlu1 %1139 }
 0x70d   : > { %v1702_v48 = vpop.permute.xlu0 %1701  ;;  %1148 = vst.msk [vmem:[#allocation9 + $0x3c] sm:$0xff] %vm441_vm4, %v1140_v47  ;;  %v1842_v47 = vld [vmem:[#allocation9 + $0x88] sm:$0xff] }
 0x70e   : > { %1708 = vst.msk [vmem:[#allocation9 + $0x2b8] sm:$0xf] %vm443_vm5, %v1702_v48  ;;  %1303 = vrot.lane.b32.xlu1 %v2917_v32, %s3397_s16  ;;  %v1928_v48 = vpack.c.bf16 %v1826_v37, %v1825_v36 }
 0x70f   : > { %1321 = vrot.lane.b32.xlu0 %v2917_v32, %s3387_s21 }
 0x710   : > { %v1266_v49 = vpop.permute.xlu1 %1265  ;;  %s419_s19 = scalar_lea.vmem %s3426_s24, %s3425_s13 }
 0x711   : > { %v1396_v50 = vpop.permute.xlu0 %1395  ;;  %1274 = vst.msk [vmem:[#allocation9 + $0xc8] sm:$0xff] %vm441_vm4, %v1266_v49 }
 0x712   : > { %1402 = vst.msk [vmem:[#allocation9 + $0x164] sm:$0xf] %vm443_vm5, %v1396_v50  ;;  %1339 = vrot.lane.b32.xlu1 %v2917_v32, %s3389_s25  ;;  %s3418_s25 = smov 113  }
 0x713   : > { %1465 = vrot.lane.b32.xlu0 %v2917_v32, %s3390_s20  ;;  %s3424_s20 = sshll.u32 %s3429_s18, 4 }
 0x714   : > { %v1158_v52 = vpop.permute.xlu1 %1157  ;;  %s406_s11 = scalar_lea.vmem %s3292_s8, %s3424_s20 }
 0x715   : > { %v1522_v53 = vpop.permute.xlu0 %1521  ;;  %1166 = vst.msk [vmem:[#allocation9 + $0x50] sm:$0xff] %vm441_vm4, %v1158_v52 }
 0x716   : > { %1528 = vst.msk [vmem:[#allocation9 + $0x1f0] sm:$0xf] %vm443_vm5, %v1522_v53  ;;  %1663 = vrot.lane.b32.xlu1 %v2917_v32, %s3399_s27  ;;  %s3419_s27 = smov 102  }
 0x717   : > { %1537 = vrot.lane.b32.xlu0 %v2917_v32, %s3398_s30  ;;  %s3421_s30 = smov 94  }
 0x718   : > { %v1428_v54 = vpop.permute.xlu1 %1427 }
 0x719   : > { %v1594_v55 = vpop.permute.xlu0 %1593  ;;  %1436 = vst.msk [vmem:[#allocation9 + $0x17c] sm:$0xff] %vm441_vm4, %v1428_v54 }
 0x71a   : > { %1600 = vst.msk [vmem:[#allocation9 + $0x240] sm:$0xf] %vm443_vm5, %v1594_v55  ;;  %1357 = vrot.lane.b32.xlu1 %v2917_v32, %s3418_s25 }
 0x71b   : > { %1483 = vrot.lane.b32.xlu0 %v2917_v32, %s3391_s14 }
 0x71c   : > { %v1320_v56 = vpop.permute.xlu1 %1319 }
 0x71d   : > { %v1414_v57 = vpop.permute.xlu0 %1413  ;;  %1328 = vst.msk [vmem:[#allocation9 + $0x104] sm:$0xff] %vm441_vm4, %v1320_v56 }
 0x71e   : > { %1420 = vst.msk [vmem:[#allocation9 + $0x178] sm:$0xf] %vm443_vm5, %v1414_v57  ;;  %1681 = vrot.lane.b32.xlu1 %v2917_v32, %s3402_s1  ;;  %s3420_s1 = smov 111  }
 0x71f   : > { %1501 = vrot.lane.b32.xlu0 %v2917_v32, %s3404_s12 }
 0x720   : > { %v1338_v58 = vpop.permute.xlu1 %1337 }
 0x721   : > { %v1774_v59 = vpop.permute.xlu0 %1773  ;;  %1346 = vst.msk [vmem:[#allocation9 + $0x118] sm:$0xff] %vm441_vm4, %v1338_v58 }
 0x722   : > { %1780 = vst.msk [vmem:[#allocation9 + $0x308] sm:$0xf] %vm443_vm5, %v1774_v59  ;;  %1555 = vrot.lane.b32.xlu1 %v2917_v32, %s3419_s27 }
 0x723   : > { %1573 = vrot.lane.b32.xlu0 %v2917_v32, %s3393_s29 }
 0x724   : > { %v1194_v60 = vpop.permute.xlu1 %1193 }
 0x725   : > { %v1738_v61 = vpop.permute.xlu0 %1737  ;;  %1202 = vst.msk [vmem:[#allocation9 + $0x78] sm:$0xff] %vm441_vm4, %v1194_v60 }
 0x726   : > { %1744 = vst.msk [vmem:[#allocation9 + $0x2e0] sm:$0xf] %vm443_vm5, %v1738_v61  ;;  %1375 = vrot.lane.b32.xlu1 %v2917_v32, %s3406_s4 }
 0x727   : > { %1393 = vrot.lane.b32.xlu0 %v2917_v32, %s3420_s1 }
 0x728   : > { %v1464_v62 = vpop.permute.xlu1 %1463 }
 0x729   : > { %v1630_v63 = vpop.permute.xlu0 %1629  ;;  %1472 = vst.msk [vmem:[#allocation9 + $0x1a4] sm:$0xff] %vm441_vm4, %v1464_v62  ;;  %v1830_v62 = vld [vmem:[#allocation9 + $0x28] sm:$0xff] }
 0x72a   : > { %1636 = vst.msk [vmem:[#allocation9 + $0x268] sm:$0xf] %vm443_vm5, %v1630_v63  ;;  %1699 = vrot.lane.b32.xlu1 %v2917_v32, %s3421_s30 }
 0x72b   : > { %1717 = vrot.lane.b32.xlu0 %v2917_v32, %s3395_s28 }
 0x72c   : > { %v1356_v1 = vpop.permute.xlu1 %1355 }
 0x72d   : > { %v1756_v2 = vpop.permute.xlu0 %1755  ;;  %1364 = vst.msk [vmem:[#allocation9 + $0x12c] sm:$0xff] %vm441_vm4, %v1356_v1  ;;  %v1847_v1 = vld [vmem:[#allocation9 + $0xb0] sm:$0xff] }
 0x72e   : > { %1762 = vst.msk [vmem:[#allocation9 + $0x2f4] sm:$0xf] %vm443_vm5, %v1756_v2  ;;  %1519 = vrot.lane.b32.xlu1 %v2917_v32, %s3407_s6 }
 0x72f   : > { %1609 = vrot.lane.b32.xlu0 %v2917_v32, %s3400_s26  ;;  %s3422_s26 = smov 110  }
 0x730   : > { %v1482_v3 = vpop.permute.xlu1 %1481 }
 0x731   : > { %v1104_v4 = vpop.permute.xlu0 %1103  ;;  %1490 = vst.msk [vmem:[#allocation9 + $0x1b8] sm:$0xff] %vm441_vm4, %v1482_v3 }
 0x732   : > { %1112 = vst.msk [vmem:[#allocation9 + $0x14] sm:$0xff] %vm441_vm4, %v1104_v4  ;;  %1591 = vrot.lane.b32.xlu1 %v2917_v32, %s3409_s10 }
 0x733   : > { %1735 = vrot.lane.b32.xlu0 %v2917_v32, %s3401_s0  ;;  %s2624_s0 = smov 88  }
 0x734   : > { %v1572_v6 = vpop.permute.xlu1 %1571 }
 0x735   : > { %v1230_v7 = vpop.permute.xlu0 %1229  ;;  %1580 = vst.msk [vmem:[#allocation9 + $0x21c] sm:$0xff] %vm441_vm4, %v1572_v6 }
 0x736   : > { %1238 = vst.msk [vmem:[#allocation9 + $0xa0] sm:$0xff] %vm441_vm4, %v1230_v7  ;;  %1411 = vrot.lane.b32.xlu1 %v2917_v32, %s3422_s26  ;;  %v1832_v7 = vld [vmem:[#allocation9 + $0x38] sm:$0xff] }
 0x737   : > { %1753 = vrot.lane.b32.xlu0 %v2917_v32, %s3405_s3  ;;  %s3423_s3 = smov 97  }
 0x738   : > { %v1698_v9 = vpop.permute.xlu1 %1697 }
 0x739   : > { %v1284_v10 = vpop.permute.xlu0 %1283  ;;  %1706 = vst.msk [vmem:[#allocation9 + $0x2a8] sm:$0xff] %vm441_vm4, %v1698_v9  ;;  %v1827_v49 = vld [vmem:[#allocation9 + $0x10] sm:$0xff] }
 0x73a   : > { %1292 = vst.msk [vmem:[#allocation9 + $0xdc] sm:$0xff] %vm441_vm4, %v1284_v10  ;;  %1771 = vrot.lane.b32.xlu1 %v2917_v32, %s3408_s9  ;;  %v1850_v10 = vld [vmem:[#allocation9 + $0xc8] sm:$0xff] }
 0x73b   : > { %1805 = vrot.lane.b32.xlu0 %v2911_v29, %s2624_s0 }
 0x73c   : > { %v1392_v11 = vpop.permute.xlu1 %1391 }
 0x73d   : > { %v1176_v12 = vpop.permute.xlu0 %1175  ;;  %1400 = vst.msk [vmem:[#allocation9 + $0x154] sm:$0xff] %vm441_vm4, %v1392_v11  ;;  %v1845_v58 = vld [vmem:[#allocation9 + $0xa0] sm:$0xff] }
 0x73e   : > { %1184 = vst.msk [vmem:[#allocation9 + $0x64] sm:$0xff] %vm441_vm4, %v1176_v12  ;;  %1627 = vrot.lane.b32.xlu1 %v2917_v32, %s3411_s17 }
 0x73f   : > { %1789 = vrot.lane.b32.xlu0 %v2917_v32, %s3403_s2 }
 0x740   : > { %v1716_v13 = vpop.permute.xlu1 %1715 }
 0x741   : > { %v1446_v14 = vpop.permute.xlu0 %1445  ;;  %1724 = vst.msk [vmem:[#allocation9 + $0x2bc] sm:$0xff] %vm441_vm4, %v1716_v13 }
 0x742   : > { %1454 = vst.msk [vmem:[#allocation9 + $0x190] sm:$0xff] %vm441_vm4, %v1446_v14  ;;  %1647 = vrot.lane.b32.xlu1 %v1639_v15, %s3423_s3 }
 0x743   : > { %1645 = vrot.lane.b32.xlu0 %v2917_v32, %s3423_s3 }
 0x744   : > { %v1410_v29 = vpop.permute.xlu1 %1409 }
 0x745   : > { %v1302_v16 = vpop.permute.xlu0 %1301  ;;  %1418 = vst.msk [vmem:[#allocation9 + $0x168] sm:$0xff] %vm441_vm4, %v1410_v29 }
 0x746   : > { %1310 = vst.msk [vmem:[#allocation9 + $0xf0] sm:$0xff] %vm441_vm4, %v1302_v16  ;;  %1807 = vrot.lane.b32.xlu1 %v2917_v32, %s2624_s0 }
 0x747   : > { %1809 = vrot.lane.b32.xlu0 %v1801_v17, %s2624_s0  ;;  %v1852_v17 = vld [vmem:[#allocation9 + $0xd8] sm:$0xff] }
 0x748   : > { %v1536_v18 = vpop.permute.xlu1 %1535 }
 0x749   : > { %v1662_v19 = vpop.permute.xlu0 %1661  ;;  %1544 = vst.msk [vmem:[#allocation9 + $0x1f4] sm:$0xff] %vm441_vm4, %v1536_v18 }
 0x74a   : > { %1670 = vst.msk [vmem:[#allocation9 + $0x280] sm:$0xff] %vm441_vm4, %v1662_v19  ;;  %v1835_v19 = vld [vmem:[#allocation9 + $0x50] sm:$0xff] }
 0x74c   : > { %v1608_v20 = vpop.permute.xlu1 %1607 }
 0x74d   : > { %v1554_v21 = vpop.permute.xlu0 %1553  ;;  %1616 = vst.msk [vmem:[#allocation9 + $0x244] sm:$0xff] %vm441_vm4, %v1608_v20 }
 0x74e   : > { %1562 = vst.msk [vmem:[#allocation9 + $0x208] sm:$0xff] %vm441_vm4, %v1554_v21 }
 0x750   : > { %v1734_v22 = vpop.permute.xlu1 %1733 }
 0x751   : > { %v1680_v23 = vpop.permute.xlu0 %1679  ;;  %1742 = vst.msk [vmem:[#allocation9 + $0x2d0] sm:$0xff] %vm441_vm4, %v1734_v22 }
 0x752   : > { %1688 = vst.msk [vmem:[#allocation9 + $0x294] sm:$0xff] %vm441_vm4, %v1680_v23 }
 0x754   : > { %v1788_v32 = vpop.permute.xlu1 %1787 }
 0x755   : > { %v1500_v24 = vpop.permute.xlu0 %1499  ;;  %1796 = vst.msk [vmem:[#allocation9 + $0x30c] sm:$0xff] %vm441_vm4, %v1788_v32 }
 0x756   : > { %1508 = vst.msk [vmem:[#allocation9 + $0x1cc] sm:$0xff] %vm441_vm4, %v1500_v24 }
 0x758   : > { %v1752_v25 = vpop.permute.xlu1 %1751 }
 0x759   : > { %v1374_v26 = vpop.permute.xlu0 %1373  ;;  %1760 = vst.msk [vmem:[#allocation9 + $0x2e4] sm:$0xff] %vm441_vm4, %v1752_v25 }
 0x75a   : > { %1382 = vst.msk [vmem:[#allocation9 + $0x140] sm:$0xff] %vm441_vm4, %v1374_v26 }
 0x75c   : > { %v1644_v27 = vpop.permute.xlu1 %1643 }
 0x75d   : > { %v1518_v5 = vpop.permute.xlu0 %1517  ;;  %1652 = vst.msk [vmem:[#allocation9 + $0x26c] sm:$0xff] %vm441_vm4, %v1644_v27 }
 0x75e   : > { %1526 = vst.msk [vmem:[#allocation9 + $0x1e0] sm:$0xff] %vm441_vm4, %v1518_v5 }
 0x760   : > { %v1770_v28 = vpop.permute.xlu1 %1769 }
 0x761   : > { %v1590_v30 = vpop.permute.xlu0 %1589  ;;  %1778 = vst.msk [vmem:[#allocation9 + $0x2f8] sm:$0xff] %vm441_vm4, %v1770_v28 }
 0x762   : > { %1598 = vst.msk [vmem:[#allocation9 + $0x230] sm:$0xff] %vm441_vm4, %v1590_v30 }
 0x764   : > { %v1196_v31 = vpop.permute.xlu1 %1195 }
 0x765   : > { %v1626_v33 = vpop.permute.xlu0 %1625  ;;  %1203 = vst.msk [vmem:[#allocation9 + $0x80] sm:$0xff] %vm441_vm4, %v1196_v31 }
 0x766   : > { %1634 = vst.msk [vmem:[#allocation9 + $0x258] sm:$0xff] %vm441_vm4, %v1626_v33  ;;  %1025 = vadd.xlane.f32.xlu0 %v2879_v43  ;;  %v1837_v33 = vld [vmem:[#allocation9 + $0x60] sm:$0xff] }
 0x768   : > { %v1106_v34 = vpop.permute.xlu1 %1105 }
 0x769   : > { %v1214_v35 = vpop.permute.xlu0 %1213  ;;  %1113 = vst.msk [vmem:[#allocation9 + $0x1c] sm:$0xff] %vm441_vm4, %v1106_v34 }
 0x76a   : > { %1221 = vst.msk [vmem:[#allocation9 + $0x94] sm:$0xff] %vm441_vm4, %v1214_v35  ;;  %1027 = vadd.xlane.f32.xlu0 %v2892_v46  ;;  %1023 = vadd.xlane.f32.xlu1 %v2883_v44  ;;  %v1857_v35 = vld [vmem:[#allocation9 + $0x100] sm:$0xff] }
 0x76c   : > { %v1232_v39 = vpop.permute.xlu1 %1231  ;;  %v1841_v45 = vld [vmem:[#allocation9 + $0x80] sm:$0xff] }
 0x76d   : > { %v1250_v41 = vpop.permute.xlu0 %1249  ;;  %1239 = vst.msk [vmem:[#allocation9 + $0xa8] sm:$0xff] %vm441_vm4, %v1232_v39  ;;  %v1936_v43 = vpack.c.bf16 %v1842_v47, %v1841_v45  ;;  %v1855_v45 = vld [vmem:[#allocation9 + $0xf0] sm:$0xff] }
 0x76e   : > { %1257 = vst.msk [vmem:[#allocation9 + $0xbc] sm:$0xff] %vm441_vm4, %v1250_v41 }
 0x76f   : > { %2374 = vmatprep.subr.bf16.mxu1 %v1936_v43 }
 0x770   : > { %v1124_v50 = vpop.permute.xlu1 %1123  ;;  %2375 = vmatpush3.bf16.msra.mxu1 %v1928_v48  ;;  %v1828_v44 = vld [vmem:[#allocation9 + $0x18] sm:$0xff]  ;;  %v1829_v55 = vld [vmem:[#allocation9 + $0x20] sm:$0xff] }
 0x771   : > { %v1142_v51 = vpop.permute.xlu0 %1141  ;;  %v1843_v46 = vld [vmem:[#allocation9 + $0x90] sm:$0xff]  ;;  %v1844_v52 = vld [vmem:[#allocation9 + $0x98] sm:$0xff]  ;;  %1131 = vst.msk [vmem:[#allocation9 + $0x30] sm:$0xff] %vm441_vm4, %v1124_v50  ;;  %v1929_v54 = vpack.c.bf16 %v1828_v44, %v1827_v49  ;;  %v1930_v63 = vpack.c.bf16 %v1830_v62, %v1829_v55 }
 0x772   : > { %1149 = vst.msk [vmem:[#allocation9 + $0x44] sm:$0xff] %vm441_vm4, %v1142_v51  ;;  %v1937_v53 = vpack.c.bf16 %v1844_v52, %v1843_v46  ;;  %v1840_v50 = vld [vmem:[#allocation9 + $0x78] sm:$0xff]  ;;  %v1875_v51 = vld [vmem:[#allocation9 + $0x190] sm:$0xff] }
 0x774   : > { %2376 = vmatprep.subr.bf16.mxu1 %v1937_v53  ;;  %v1286_v56 = vpop.permute.xlu1 %1285  ;;  %v1846_v59 = vld [vmem:[#allocation9 + $0xa8] sm:$0xff]  ;;  %v1860_v53 = vld [vmem:[#allocation9 + $0x118] sm:$0xff] }
 0x775   : > { %2377 = vmatpush3.bf16.msra.mxu1 %v1929_v54  ;;  %v1268_v57 = vpop.permute.xlu0 %1267  ;;  %v1848_v60 = vld [vmem:[#allocation9 + $0xb8] sm:$0xff]  ;;  %1293 = vst.msk [vmem:[#allocation9 + $0xe4] sm:$0xff] %vm441_vm4, %v1286_v56  ;;  %v1938_v61 = vpack.c.bf16 %v1846_v59, %v1845_v58  ;;  %v1849_v8 = vld [vmem:[#allocation9 + $0xc0] sm:$0xff]  ;;  %v2541_v54 = vld [vmem:[%s3291_s7] ss:$28 sps:$4 sm:$0x3f]  }
 0x776   : > { %1275 = vst.msk [vmem:[#allocation9 + $0xd0] sm:$0xff] %vm441_vm4, %v1268_v57  ;;  %v1939_v2 = vpack.c.bf16 %v1848_v60, %v1847_v1  ;;  %v1940_v11 = vpack.c.bf16 %v1850_v10, %v1849_v8  ;;  %v1877_v57 = vld [vmem:[#allocation9 + $0x1a0] sm:$0xff]  ;;  %v1890_v8 = vld [vmem:[#allocation9 + $0x208] sm:$0xff] }
 0x777   : > { %2378 = vmatprep.subr.bf16.mxu1 %v1938_v61  ;;  %v2549_v59 = vld [vmem:[%s3291_s7 + $0x14] ss:$28 sps:$4 sm:$0x3f]  }
 0x778   : > { %v1178_v3 = vpop.permute.xlu1 %1177  ;;  %v1831_v6 = vld [vmem:[#allocation9 + $0x30] sm:$0xff]  ;;  %v1905_v1 = vld [vmem:[#allocation9 + $0x280] sm:$0xff] }
 0x779   : > { %2379 = vmatpush3.bf16.msra.mxu1 %v1930_v63  ;;  %v1160_v4 = vpop.permute.xlu0 %1159  ;;  %1185 = vst.msk [vmem:[#allocation9 + $0x6c] sm:$0xff] %vm441_vm4, %v1178_v3  ;;  %v1931_v9 = vpack.c.bf16 %v1832_v7, %v1831_v6  ;;  %v1833_v12 = vld [vmem:[#allocation9 + $0x40] sm:$0xff]  ;;  %v1834_v13 = vld [vmem:[#allocation9 + $0x48] sm:$0xff] }
 0x77a   : > { %1167 = vst.msk [vmem:[#allocation9 + $0x58] sm:$0xff] %vm441_vm4, %v1160_v4  ;;  %2380 = vmatprep.subr.bf16.mxu1 %v1939_v2  ;;  %v1932_v16 = vpack.c.bf16 %v1834_v13, %v1833_v12  ;;  %v1862_v63 = vld [vmem:[#allocation9 + $0x128] sm:$0xff] }
 0x77c   : > { %v1448_v14 = vpop.permute.xlu1 %1447  ;;  %v1853_v23 = vld [vmem:[#allocation9 + $0xe0] sm:$0xff]  ;;  %v1854_v32 = vld [vmem:[#allocation9 + $0xe8] sm:$0xff] }
 0x77d   : > { %2381 = vmatpush3.bf16.msra.mxu1 %v1931_v9  ;;  %v1430_v15 = vpop.permute.xlu0 %1429  ;;  %v1851_v29 = vld [vmem:[#allocation9 + $0xd0] sm:$0xff]  ;;  %1455 = vst.msk [vmem:[#allocation9 + $0x198] sm:$0xff] %vm441_vm4, %v1448_v14  ;;  %v1942_v25 = vpack.c.bf16 %v1854_v32, %v1853_v23  ;;  %v1882_v14 = vld [vmem:[#allocation9 + $0x1c8] sm:$0xff] }
 0x77e   : > { %1437 = vst.msk [vmem:[#allocation9 + $0x184] sm:$0xff] %vm441_vm4, %v1430_v15  ;;  %2382 = vmatprep.subr.bf16.mxu1 %v1940_v11  ;;  %v1941_v18 = vpack.c.bf16 %v1852_v17, %v1851_v29  ;;  %v1880_v11 = vld [vmem:[#allocation9 + $0x1b8] sm:$0xff]  ;;  %v1907_v23 = vld [vmem:[#allocation9 + $0x290] sm:$0xff] }
 0x780   : > { %v1304_v20 = vpop.permute.xlu1 %1303  ;;  %v1838_v26 = vld [vmem:[#allocation9 + $0x68] sm:$0xff]  ;;  %v1839_v36 = vld [vmem:[#allocation9 + $0x70] sm:$0xff] }
 0x781   : > { %2383 = vmatpush3.bf16.msra.mxu1 %v1932_v16  ;;  %v1322_v21 = vpop.permute.xlu0 %1321  ;;  %v1836_v22 = vld [vmem:[#allocation9 + $0x58] sm:$0xff]  ;;  %1311 = vst.msk [vmem:[#allocation9 + $0xf8] sm:$0xff] %vm441_vm4, %v1304_v20  ;;  %v1934_v34 = vpack.c.bf16 %v1838_v26, %v1837_v33  ;;  %v1935_v46 = vpack.c.bf16 %v1840_v50, %v1839_v36 }
 0x782   : > { %1329 = vst.msk [vmem:[#allocation9 + $0x10c] sm:$0xff] %vm441_vm4, %v1322_v21  ;;  %2384 = vmatprep.subr.bf16.mxu1 %v1941_v18  ;;  %v1933_v24 = vpack.c.bf16 %v1836_v22, %v1835_v19 }
 0x784   : > { %v1340_v27 = vpop.permute.xlu1 %1339  ;;  %v1876_v37 = vld [vmem:[#allocation9 + $0x198] sm:$0xff] }
 0x785   : > { %2385 = vmatpush3.bf16.msra.mxu1 %v1933_v24  ;;  %v1466_v5 = vpop.permute.xlu0 %1465  ;;  %v1873_v28 = vld [vmem:[#allocation9 + $0x180] sm:$0xff]  ;;  %v1874_v30 = vld [vmem:[#allocation9 + $0x188] sm:$0xff]  ;;  %1347 = vst.msk [vmem:[#allocation9 + $0x120] sm:$0xff] %vm441_vm4, %v1340_v27  ;;  %v1953_v52 = vpack.c.bf16 %v1876_v37, %v1875_v51 }
 0x786   : > { %1473 = vst.msk [vmem:[#allocation9 + $0x1ac] sm:$0xff] %vm441_vm4, %v1466_v5  ;;  %2386 = vmatprep.subr.bf16.mxu1 %v1942_v25  ;;  %v1952_v31 = vpack.c.bf16 %v1874_v30, %v1873_v28  ;;  %v1892_v28 = vld [vmem:[#allocation9 + $0x218] sm:$0xff] }
 0x788   : > { %2396 = vmatprep.subr.bf16.mxu0 %v1952_v31  ;;  %v1664_v39 = vpop.permute.xlu1 %1663  ;;  %v1856_v47 = vld [vmem:[#allocation9 + $0xf8] sm:$0xff]  ;;  %v1910_v31 = vld [vmem:[#allocation9 + $0x2a8] sm:$0xff] }
 0x789   : > { %2387 = vmatpush3.bf16.msra.mxu1 %v1934_v34  ;;  %v1538_v41 = vpop.permute.xlu0 %1537  ;;  %v1858_v43 = vld [vmem:[#allocation9 + $0x108] sm:$0xff]  ;;  %1671 = vst.msk [vmem:[#allocation9 + $0x288] sm:$0xff] %vm441_vm4, %v1664_v39  ;;  %v1943_v48 = vpack.c.bf16 %v1856_v47, %v1855_v45  ;;  %v1859_v44 = vld [vmem:[#allocation9 + $0x110] sm:$0xff]  ;;  %v1865_v45 = vld [vmem:[#allocation9 + $0x140] sm:$0xff] }
 0x78a   : > { %1545 = vst.msk [vmem:[#allocation9 + $0x1fc] sm:$0xff] %vm441_vm4, %v1538_v41  ;;  %v1944_v49 = vpack.c.bf16 %v1858_v43, %v1857_v35  ;;  %v1945_v60 = vpack.c.bf16 %v1860_v53, %v1859_v44  ;;  %v1912_v53 = vld [vmem:[#allocation9 + $0x2b8] sm:$0xff] }
 0x78b   : > { %2388 = vmatprep.subr.bf16.mxu1 %v1943_v48 }
 0x78c   : > { %2397 = vmatpush3.bf16.msra.mxu0 %v1944_v49  ;;  %v1358_v55 = vpop.permute.xlu1 %1357  ;;  %v1861_v62 = vld [vmem:[#allocation9 + $0x120] sm:$0xff] }
 0x78d   : > { %2389 = vmatpush3.bf16.msra.mxu1 %v1935_v46  ;;  %2398 = vmatprep.subr.bf16.mxu0 %v1953_v52  ;;  %v1484_v56 = vpop.permute.xlu0 %1483  ;;  %v1878_v58 = vld [vmem:[#allocation9 + $0x1a8] sm:$0xff]  ;;  %1365 = vst.msk [vmem:[#allocation9 + $0x134] sm:$0xff] %vm441_vm4, %v1358_v55  ;;  %v1879_v2 = vld [vmem:[#allocation9 + $0x1b0] sm:$0xff]  ;;  %v1946_v9 = vpack.c.bf16 %v1862_v63, %v1861_v62 }
 0x78e   : > { %1491 = vst.msk [vmem:[#allocation9 + $0x1c0] sm:$0xff] %vm441_vm4, %v1484_v56  ;;  %v1954_v61 = vpack.c.bf16 %v1878_v58, %v1877_v57  ;;  %v1955_v13 = vpack.c.bf16 %v1880_v11, %v1879_v2  ;;  %v1867_v52 = vld [vmem:[#allocation9 + $0x150] sm:$0xff]  ;;  %v1870_v63 = vld [vmem:[#allocation9 + $0x168] sm:$0xff] }
 0x78f   : > { %v1887_v2 = vld [vmem:[#allocation9 + $0x1f0] sm:$0xff] }
 0x790   : > { %2399 = vmatpush3.bf16.msra.mxu0 %v1945_v60  ;;  %2054 = vmatmul.mubr.bf16.vlgmr.msra.gmra.mrb[8].mxu1 %v2541_v54  ;;  %v1682_v3 = vpop.permute.xlu1 %1681  ;;  %v1906_v6 = vld [vmem:[#allocation9 + $0x288] sm:$0xff] }
 0x791   : > { %2400 = vmatprep.subr.bf16.mxu0 %v1954_v61  ;;  %v1502_v4 = vpop.permute.xlu0 %1501  ;;  %v1889_v7 = vld [vmem:[#allocation9 + $0x200] sm:$0xff]  ;;  %2135 = vmatprep.mubr.bf16.mxu1 %v2549_v59  ;;  %1689 = vst.msk [vmem:[#allocation9 + $0x29c] sm:$0xff] %vm441_vm4, %v1682_v3  ;;  %v1968_v10 = vpack.c.bf16 %v1906_v6, %v1905_v1  ;;  %v1888_v61 = vld [vmem:[#allocation9 + $0x1f8] sm:$0xff] }
 0x792   : > { %1509 = vst.msk [vmem:[#allocation9 + $0x1d4] sm:$0xff] %vm441_vm4, %v1502_v4  ;;  %v1960_v12 = vpack.c.bf16 %v1890_v8, %v1889_v7  ;;  %v1885_v59 = vld [vmem:[#allocation9 + $0x1e0] sm:$0xff]  ;;  %v1959_v3 = vpack.c.bf16 %v1888_v61, %v1887_v2 }
 0x793   : > { %2418 = vmatprep.subr.bf16.mxu1 %v1968_v10 }
 0x794   : > { %2401 = vmatpush3.bf16.msra.mxu0 %v1946_v9  ;;  %v1556_v15 = vpop.permute.xlu1 %1555  ;;  %2419 = vmatpush3.bf16.msra.mxu1 %v1960_v12  ;;  %v1863_v16 = vld [vmem:[#allocation9 + $0x130] sm:$0xff]  ;;  %v1864_v17 = vld [vmem:[#allocation9 + $0x138] sm:$0xff] }
 0x795   : > { %2402 = vmatprep.subr.bf16.mxu0 %v1955_v13  ;;  %v1574_v29 = vpop.permute.xlu0 %1573  ;;  %v1881_v18 = vld [vmem:[#allocation9 + $0x1c0] sm:$0xff]  ;;  %1563 = vst.msk [vmem:[#allocation9 + $0x210] sm:$0xff] %vm441_vm4, %v1556_v15  ;;  %v1947_v19 = vpack.c.bf16 %v1864_v17, %v1863_v16  ;;  %v1895_v9 = vld [vmem:[#allocation9 + $0x230] sm:$0xff]  ;;  %v1872_v17 = vld [vmem:[#allocation9 + $0x178] sm:$0xff] }
 0x796   : > { %1581 = vst.msk [vmem:[#allocation9 + $0x224] sm:$0xff] %vm441_vm4, %v1574_v29  ;;  %v1956_v20 = vpack.c.bf16 %v1882_v14, %v1881_v18  ;;  %v1897_v18 = vld [vmem:[#allocation9 + $0x240] sm:$0xff] }
 0x798   : > { %2403 = vmatpush3.bf16.msra.mxu0 %v1947_v19  ;;  %v1376_v21 = vpop.permute.xlu1 %1375  ;;  %v1908_v32 = vld [vmem:[#allocation9 + $0x298] sm:$0xff]  ;;  %v1909_v25 = vld [vmem:[#allocation9 + $0x2a0] sm:$0xff] }
 0x799   : > { %2404 = vmatprep.subr.bf16.mxu0 %v1956_v20  ;;  %v1394_v22 = vpop.permute.xlu0 %1393  ;;  %1383 = vst.msk [vmem:[#allocation9 + $0x148] sm:$0xff] %vm441_vm4, %v1376_v21  ;;  %v1969_v24 = vpack.c.bf16 %v1908_v32, %v1907_v23  ;;  %v1970_v33 = vpack.c.bf16 %v1910_v31, %v1909_v25  ;;  %v1883_v36 = vld [vmem:[#allocation9 + $0x1d0] sm:$0xff]  ;;  %v1884_v37 = vld [vmem:[#allocation9 + $0x1d8] sm:$0xff] }
 0x79a   : > { %1401 = vst.msk [vmem:[#allocation9 + $0x15c] sm:$0xff] %vm441_vm4, %v1394_v22  ;;  %v1957_v49 = vpack.c.bf16 %v1884_v37, %v1883_v36  ;;  %v1915_v21 = vld [vmem:[#allocation9 + $0x2d0] sm:$0xff] }
 0x79b   : > { %2420 = vmatprep.subr.bf16.mxu1 %v1969_v24  ;;  %v2544_v23 = vld [vmem:[%s3291_s7 + $0x8] ss:$28 sps:$4 sm:$0x3f]  }
 0x79c   : > { %v1700_v26 = vpop.permute.xlu1 %1699  ;;  %v1891_v5 = vld [vmem:[#allocation9 + $0x210] sm:$0xff] }
 0x79d   : > { %v1718_v27 = vpop.permute.xlu0 %1717  ;;  %1707 = vst.msk [vmem:[#allocation9 + $0x2b0] sm:$0xff] %vm441_vm4, %v1700_v26  ;;  %v1961_v30 = vpack.c.bf16 %v1892_v28, %v1891_v5  ;;  %v1893_v34 = vld [vmem:[#allocation9 + $0x220] sm:$0xff]  ;;  %v1894_v35 = vld [vmem:[#allocation9 + $0x228] sm:$0xff] }
 0x79e   : > { %1725 = vst.msk [vmem:[#allocation9 + $0x2c4] sm:$0xff] %vm441_vm4, %v1718_v27  ;;  %v1962_v48 = vpack.c.bf16 %v1894_v35, %v1893_v34  ;;  %v1900_v27 = vld [vmem:[#allocation9 + $0x258] sm:$0xff]  ;;  %v1922_v28 = vld [vmem:[#allocation9 + $0x308] sm:$0xff] }
 0x79f   : > { %2421 = vmatpush3.bf16.msra.mxu1 %v1961_v30  ;;  %v1902_v35 = vld [vmem:[#allocation9 + $0x268] sm:$0xff] }
 0x7a0   : > { %v1520_v39 = vpop.permute.xlu1 %1519  ;;  %2422 = vmatprep.subr.bf16.mxu1 %v1970_v33  ;;  %v1866_v47 = vld [vmem:[#allocation9 + $0x148] sm:$0xff]  ;;  %v1917_v33 = vld [vmem:[#allocation9 + $0x2e0] sm:$0xff] }
 0x7a1   : > { %v1610_v41 = vpop.permute.xlu0 %1609  ;;  %1527 = vst.msk [vmem:[#allocation9 + $0x1e8] sm:$0xff] %vm441_vm4, %v1520_v39  ;;  %v1948_v43 = vpack.c.bf16 %v1866_v47, %v1865_v45  ;;  %v1868_v50 = vld [vmem:[#allocation9 + $0x158] sm:$0xff]  ;;  %v1869_v56 = vld [vmem:[#allocation9 + $0x160] sm:$0xff] }
 0x7a2   : > { %1617 = vst.msk [vmem:[#allocation9 + $0x24c] sm:$0xff] %vm441_vm4, %v1610_v41  ;;  %v1949_v54 = vpack.c.bf16 %v1868_v50, %v1867_v52  ;;  %v1950_v1 = vpack.c.bf16 %v1870_v63, %v1869_v56 }
 0x7a3   : > { %2405 = vmatpush3.bf16.msra.mxu0 %v1948_v43  ;;  %2423 = vmatpush3.bf16.msra.mxu1 %v1962_v48 }
 0x7a4   : > { %v1592_v51 = vpop.permute.xlu1 %1591  ;;  %2406 = vmatprep.subr.bf16.mxu0 %v1957_v49  ;;  %v1911_v44 = vld [vmem:[#allocation9 + $0x2b0] sm:$0xff]  ;;  %v1920_v49 = vld [vmem:[#allocation9 + $0x2f8] sm:$0xff] }
 0x7a5   : > { %v1736_v46 = vpop.permute.xlu0 %1735  ;;  %1599 = vst.msk [vmem:[#allocation9 + $0x238] sm:$0xff] %vm441_vm4, %v1592_v51  ;;  %v1971_v55 = vpack.c.bf16 %v1912_v53, %v1911_v44  ;;  %v1913_v4 = vld [vmem:[#allocation9 + $0x2c0] sm:$0xff]  ;;  %v1914_v6 = vld [vmem:[#allocation9 + $0x2c8] sm:$0xff] }
 0x7a6   : > { %1743 = vst.msk [vmem:[#allocation9 + $0x2d8] sm:$0xff] %vm441_vm4, %v1736_v46  ;;  %v1972_v12 = vpack.c.bf16 %v1914_v6, %v1913_v4  ;;  %v2547_v44 = vld [vmem:[%s3291_s7 + $0x10] ss:$28 sps:$4 sm:$0x3f]  }
 0x7a7   : > { %2407 = vmatpush3.bf16.msra.mxu0 %v1949_v54  ;;  %2424 = vmatprep.subr.bf16.mxu1 %v1971_v55 }
 0x7a8   : > { %v1412_v57 = vpop.permute.xlu1 %1411  ;;  %v1886_v60 = vld [vmem:[#allocation9 + $0x1e8] sm:$0xff] }
 0x7a9   : > { %v1754_v58 = vpop.permute.xlu0 %1753  ;;  %1419 = vst.msk [vmem:[#allocation9 + $0x170] sm:$0xff] %vm441_vm4, %v1412_v57  ;;  %v1958_v62 = vpack.c.bf16 %v1886_v60, %v1885_v59  ;;  %v1898_v13 = vld [vmem:[#allocation9 + $0x248] sm:$0xff]  ;;  %v1899_v32 = vld [vmem:[#allocation9 + $0x250] sm:$0xff] }
 0x7aa   : > { %1761 = vst.msk [vmem:[#allocation9 + $0x2ec] sm:$0xff] %vm441_vm4, %v1754_v58  ;;  %v1964_v20 = vpack.c.bf16 %v1898_v13, %v1897_v18  ;;  %v1965_v30 = vpack.c.bf16 %v1900_v27, %v1899_v32  ;;  %v2550_v59 = vld [vmem:[%s3291_s7 + $0x18] ss:$28 sps:$4 sm:$0x3f]  }
 0x7ab   : > { %2408 = vmatprep.subr.bf16.mxu0 %v1958_v62 }
 0x7ac   : > { %v1772_v7 = vpop.permute.xlu1 %1771  ;;  %2409 = vmatpush3.bf16.msra.mxu0 %v1950_v1  ;;  %v1896_v10 = vld [vmem:[#allocation9 + $0x238] sm:$0xff] }
 0x7ad   : > { %v1806_v8 = vpop.permute.xlu0 %1805  ;;  %1779 = vst.msk [vmem:[#allocation9 + $0x300] sm:$0xff] %vm441_vm4, %v1772_v7  ;;  %2410 = vmatprep.subr.bf16.mxu0 %v1959_v3  ;;  %v1963_v11 = vpack.c.bf16 %v1896_v10, %v1895_v9  ;;  %v1916_v14 = vld [vmem:[#allocation9 + $0x2d8] sm:$0xff] }
 0x7ae   : > { %1814 = vst.msk [vmem:[#allocation9 + $0x320] sm:$0xff] %vm441_vm4, %v1806_v8  ;;  %v1973_v22 = vpack.c.bf16 %v1916_v14, %v1915_v21 }
 0x7af   : > { %2425 = vmatpush3.bf16.msra.mxu1 %v1963_v11 }
 0x7b0   : > { %v1628_v15 = vpop.permute.xlu1 %1627  ;;  %2426 = vmatprep.subr.bf16.mxu1 %v1972_v12  ;;  %v1871_v16 = vld [vmem:[#allocation9 + $0x170] sm:$0xff] }
 0x7b1   : > { %v1790_v29 = vpop.permute.xlu0 %1789  ;;  %1635 = vst.msk [vmem:[#allocation9 + $0x260] sm:$0xff] %vm441_vm4, %v1628_v15  ;;  %v1951_v19 = vpack.c.bf16 %v1872_v17, %v1871_v16  ;;  %v1918_v24 = vld [vmem:[#allocation9 + $0x2e8] sm:$0xff]  ;;  %v1919_v36 = vld [vmem:[#allocation9 + $0x2f0] sm:$0xff] }
 0x7b2   : > { %1797 = vst.msk [vmem:[#allocation9 + $0x314] sm:$0xff] %vm441_vm4, %v1790_v29  ;;  %v1974_v34 = vpack.c.bf16 %v1918_v24, %v1917_v33  ;;  %v1975_v50 = vpack.c.bf16 %v1920_v49, %v1919_v36 }
 0x7b3   : > { %2411 = vmatpush3.bf16.msra.mxu0 %v1951_v19  ;;  %2427 = vmatpush3.bf16.msra.mxu1 %v1964_v20 }
 0x7b4   : > { %v1648_v25 = vpop.permute.xlu1 %1647  ;;  %2428 = vmatprep.subr.bf16.mxu1 %v1973_v22  ;;  %2465 = vmatprep.subr.bf16.mxu0 %v2579_v0  ;;  %v1921_v5 = vld [vmem:[#allocation9 + $0x300] sm:$0xff] }
 0x7b5   : > { %v1646_v26 = vpop.permute.xlu0 %1645  ;;  %1654 = vst.msk [vmem:[#allocation9 + $0x27c] sm:$0xf] %vm443_vm5, %v1648_v25  ;;  %v1976_v31 = vpack.c.bf16 %v1922_v28, %v1921_v5  ;;  %v1925_v53 = vld [vmem:[#allocation9 + $0x320] sm:$0xff] }
 0x7b6   : > { %1653 = vst.msk [vmem:[#allocation9 + $0x274] sm:$0xff] %vm441_vm4, %v1646_v26  ;;  %2095 = vmatmul.mubr.bf16.vlgmr.msra.gmra.mrb[4].mxu0 %v2544_v23 }
 0x7b7   : > { %2429 = vmatpush3.bf16.msra.mxu1 %v1965_v30  ;;  %2466 = vmatpush3.bf16.msra.mxu0 %v1976_v31 }
 0x7b8   : > { %v1808_v37 = vpop.permute.xlu1 %1807  ;;  %2430 = vmatprep.subr.bf16.mxu1 %v1974_v34  ;;  %2467 = vmatprep.subr.bf16.mxu0 %v2579_v0  ;;  %v1901_v41 = vld [vmem:[#allocation9 + $0x260] sm:$0xff] }
 0x7b9   : > { %v1810_v39 = vpop.permute.xlu0 %1809  ;;  %v1923_v45 = vld [vmem:[#allocation9 + $0x310] sm:$0xff]  ;;  %v1924_v47 = vld [vmem:[#allocation9 + $0x318] sm:$0xff]  ;;  %1815 = vst.msk [vmem:[#allocation9 + $0x328] sm:$0xff] %vm441_vm4, %v1808_v37  ;;  %v1966_v43 = vpack.c.bf16 %v1902_v35, %v1901_v41  ;;  %2473 = vmatprep.mubr.msk.bf16.mxu0 %vm2597_vm12, %v2579_v0 }
 0x7ba   : > { %1816 = vst.msk [vmem:[#allocation9 + $0x330] sm:$0xf] %vm443_vm5, %v1810_v39  ;;  %v1977_v48 = vpack.c.bf16 %v1924_v47, %v1923_v45 }
 0x7bb   : > { %2431 = vmatpush3.bf16.msra.mxu1 %v1966_v43 }
 0x7bc   : > { %2468 = vmatpush3.bf16.msra.mxu0 %v1977_v48  ;;  %2432 = vmatprep.subr.bf16.mxu1 %v1975_v50 }
 0x7bd   : > { %v1903_v51 = vld [vmem:[#allocation9 + $0x270] sm:$0xff]  ;;  %v1904_v46 = vld [vmem:[#allocation9 + $0x278] sm:$0xff]  ;;  %2469 = vmatprep.subr.bf16.mxu0 %v2579_v0 }
 0x7be   : > { %v1967_v52 = vpack.c.bf16 %v1904_v46, %v1903_v51 }
 0x7c0   : > { %2433 = vmatpush3.bf16.msra.mxu1 %v1967_v52  ;;  %v1926_v54 = vld [vmem:[#allocation9 + $0x328] sm:$0xff] }
 0x7c1   : > { %v1927_v55 = vld [vmem:[#allocation9 + $0x330] sm:$0xf]  ;;  %v1978_v56 = vpack.c.bf16 %v1926_v54, %v1925_v53 }
 0x7c2   : > { %v1979_v57 = vpack.c.bf16 %v1927_v55, %v1927_v55 }
 0x7c3   : > { %2136 = vmatmul.mubr.bf16.vlgmr.msra.gmra.mrb[12].mxu1 %v2547_v44  ;;  %2470 = vmatpush3.bf16.msra.mxu0 %v1978_v56 }
 0x7c4   : > { %2471 = vmatprep.subr.bf16.mxu0 %v2579_v0  ;;  %v2019_v58 = vsel %vm675_vm7, %v1979_v57, 0 }
 0x7c7   : > { %2472 = vmatpush3.bf16.msra.mxu0 %v2019_v58 }
 0x7ca   : > { %2474 = vmatmul.mubr.msk.bf16.vlgmr.msra.gmra.mrb[8].mxu0 %vm671_vm6, %v2550_v59  ;;  %vm1067_vm6 = vcmask 3072  }
 0x7f3   : > { %v1026_v60 = vpop.xlane.xlu0 %1025 }
 0x7f4   : > { %v1030_v61 = vadd.f32 1e-07, %v1026_v60 }
 0x7f6   : > { %2559 = vrcp.f32 %v1030_v61 }
 0x7f7   : > { %v1028_v62 = vpop.xlane.xlu0 %1027  ;;  %v1024_v1 = vpop.xlane.xlu1 %1023 }
 0x7f8   : > { %v1031_v63 = vadd.f32 1e-07, %v1028_v62  ;;  %v1029_v2 = vadd.f32 1e-07, %v1024_v1 }
 0x7fa   : > { %2561 = vrcp.f32 %v1031_v63 }
 0x7fb   : > { %2563 = vrcp.f32 %v1029_v2 }
 0x800   : > { %v2560_v3 = vpop.eup %2559 }
 0x801   : > { %v1036_v0 = vmul.f32 %v2560_v3, %v2872_v42 }
 0x803   : > { %v1039_v4 = vadd.f32 1e-07, %v1036_v0 }
 0x804   : > { %v2562_v6 = vpop.eup %2561 }
 0x805   : > { %v2564_v7 = vpop.eup %2563  ;;  %2565 = vlog2.f32 %v1039_v4  ;;  %v1037_v8 = vmul.f32 %v2562_v6, %v2865_v38 }
 0x806   : > { %v1035_v9 = vmul.f32 %v2564_v7, %v2867_v40 }
 0x807   : > { %v1040_v10 = vadd.f32 1e-07, %v1037_v8 }
 0x808   : > { %v1038_v11 = vadd.f32 1e-07, %v1035_v9 }
 0x809   : > { %2567 = vlog2.f32 %v1040_v10 }
 0x80a   : > { %2569 = vlog2.f32 %v1038_v11 }
 0x80f   : > { %v2566_v12 = vpop.eup %2565 }
 0x810   : > { %v1044_v13 = vmul.f32 0.6931472, %v2566_v12 }
 0x812   : > { %v1048_v14 = vmul.f32 %v1044_v13, %v1036_v0 }
 0x813   : > { %v2568_v15 = vpop.eup %2567 }
 0x814   : > { %v2570_v29 = vpop.eup %2569  ;;  %v1053_v16 = vsel %vm441_vm4, %v1048_v14, 0.0  ;;  %v1046_v17 = vmul.f32 0.6931472, %v2568_v15 }
 0x815   : > { %1054 = vadd.xlane.f32.xlu0 %v1053_v16  ;;  %v1042_v42 = vmul.f32 0.6931472, %v2570_v29 }
 0x816   : > { %v1049_v38 = vmul.f32 %v1046_v17, %v1037_v8 }
 0x817   : > { %v1047_v18 = vmul.f32 %v1042_v42, %v1035_v9 }
 0x818   : > { %v1056_v40 = vsel %vm443_vm5, %v1049_v38, 0.0 }
 0x819   : > { %v1050_v19 = vsel %vm441_vm4, %v1047_v18, 0.0 }
 0x81a   : > { %1051 = vadd.xlane.f32.xlu1 %v1050_v19 }
 0x81e   : > { %1057 = vadd.xlane.f32.xlu1 %v1056_v40 }
 0x863   : > { %v2390_v20 = vpop.f32.mrb[8].mxu1 }
 0x864   : > { %v2391_v21 = vpop.f32.mrb[9].mxu1 }
 0x865   : > { %v2392_v22 = vadd.f32 %v2391_v21, %v2390_v20  ;;  %v2393_v23 = vpop.f32.mrb[10].mxu1 }
 0x866   : > { %v2394_v32 = vpop.f32.mrb[11].mxu1 }
 0x867   : > { %v2395_v24 = vadd.f32 %v2394_v32, %v2393_v23 }
 0x889   : > { %v2412_v25 = vpop.f32.mrb[4].mxu0 }
 0x88a   : > { %v2413_v26 = vpop.f32.mrb[5].mxu0 }
 0x88b   : > { %v2414_v27 = vadd.f32 %v2413_v26, %v2412_v25  ;;  %v2415_v5 = vpop.f32.mrb[6].mxu0 }
 0x88c   : > { %v2416_v28 = vpop.f32.mrb[7].mxu0 }
 0x88d   : > { %v2097_v30 = vadd.f32 %v2414_v27, %v2392_v22  ;;  %v2417_v31 = vadd.f32 %v2416_v28, %v2415_v5 }
 0x88f   : > { %v2100_v33 = vadd.f32 %v2417_v31, %v2395_v24 }
 0x896   : > { %v2434_v34 = vpop.f32.mrb[12].mxu1 }
 0x897   : > { %v2435_v35 = vpop.f32.mrb[13].mxu1 }
 0x898   : > { %v2436_v36 = vadd.f32 %v2435_v35, %v2434_v34  ;;  %v2437_v37 = vpop.f32.mrb[14].mxu1 }
 0x899   : > { %v2438_v39 = vpop.f32.mrb[15].mxu1 }
 0x89a   : > { %v2439_v41 = vadd.f32 %v2438_v39, %v2437_v37  ;;  %v2138_v45 = vadd.f32 %v2436_v36, %v2097_v30 }
 0x89c   : > { %v2141_v47 = vadd.f32 %v2439_v41, %v2100_v33 }
 0x89d   : > { %v2178_v43 = vpop.f32.mrb[8].mxu0 }
 0x89e   : > { %v2179_v48 = vadd.f32 %v2178_v43, %v2138_v45  ;;  %v2475_v49 = vpop.f32.mrb[9].mxu0 }
 0x89f   : > { %v2181_v50 = vpop.f32.mrb[10].mxu0 }
 0x8a0   : > { %2185 = vst.msk [vmem:[%s406_s11] sm:$0xff] %vm441_vm4, %v2179_v48  ;;  %v2182_v51 = vadd.f32 %v2181_v50, %v2141_v47  ;;  %v2476_v46 = vpop.f32.mrb[11].mxu0 }
 0x8a2   : > { %v1055_v52 = vpop.xlane.xlu0 %1054  ;;  %2186 = vst.msk [vmem:[%s406_s11 + $0x8] sm:$0xf] %vm443_vm5, %v2182_v51 }
 0x8a3   : > { %v1060_v44 = vsub.f32 0.0, %v1055_v52 }
 0x8a5   : > { %1066 = vst.msk [vmem:[%s419_s19 + $0x8] sm:$0xff] %vm1064_vm3, %v1060_v44 }
 0x8a7   : > { %v1052_v53 = vpop.xlane.xlu1 %1051 }
 0x8a8   : > { %v1059_v54 = vsub.f32 0.0, %v1052_v53 }
 0x8aa   : > { %1065 = vst.msk [vmem:[%s419_s19] sm:$0xff] %vm1064_vm3, %v1059_v54 }
 0x8ab   : > { %v1058_v55 = vpop.xlane.xlu1 %1057 }
 0x8ac   : > { %v1061_v56 = vsub.f32 0.0, %v1058_v55 }
 0x8ae   : > { %1068 = vst.msk [vmem:[%s419_s19 + $0x10] sm:$0xf] %vm1067_vm6, %v1061_v56 }
 0x8af PF: > { %s3427_s25 = sld [smem:[#allocation10_spill]] }
 0x8b5   : > { %s22_s17 = sadd.s32 1, %s3427_s25  }
 0x8b6   : > { %p19_p4 = scmp.ge.s32.totalorder %s22_s17, 4  }
 0x8b8   :  { %21 = sbr.rel (!%p19_p4) target bundleno = 11 (0xb), region = 118 }

</bundles_post_ra>
